<compile_context>
chip_gen: v5e
topology: v5e:2x2
jax: 0.10.0
libtpu: 0.0.40
codegen_flags: <defaults>
</compile_context>

<pallas_src>
import jax
import jax.numpy as jnp
from jax.experimental import pallas as pl
from jax.experimental.pallas import tpu as pltpu

# ---- small synthetic config (distilbert-like, scaled down) ----
VOCAB = 100
MAX_POS = 64
DIM = 64            # transformer.config.dim
N_LAYERS = 2
N_HEADS = 4
HEAD_DIM = DIM // N_HEADS
FFN_DIM = 128       # hidden_dim of the FFN
HEAD_HIDDEN = 32    # hidden_size of the regression head
LN_EPS = 1e-12      # DistilBERT LayerNorm eps

B, S = 2, 8         # batch, sequence length


# --------------------------- fused Pallas kernel ---------------------------

def _ln_f32(x, g, b):
    """LayerNorm with f32 statistics (safe on v5e, cheap XLU reduce)."""
    mu = jnp.mean(x, axis=-1, keepdims=True)
    xc = x - mu
    var = jnp.mean(xc * xc, axis=-1, keepdims=True)
    return xc * jax.lax.rsqrt(var + LN_EPS) * g + b


def _fused_forward_kernel(
    # per-example activations (one grid step == one batch element)
    x_ref,            # (S, DIM)  f32   word+pos embeddings (pre-LN)
    mask_ref,         # (1, S)    f32   1=keep, 0=pad
    # embedding LayerNorm
    emb_g_ref, emb_b_ref,                    # (1, DIM) f32
    # per-layer stacked weights (leading dim = layer)
    wqkv_ref, bqkv_ref,                      # (L, DIM, 3*DIM) bf16 / (L, 1, 3*DIM) f32
    wo_ref, bo_ref,                          # (L, DIM, DIM)   bf16 / (L, 1, DIM)   f32
    ln1_g_ref, ln1_b_ref,                    # (L, 1, DIM) f32
    wff1_ref, bff1_ref,                      # (L, DIM, FFN_DIM) bf16 / (L, 1, FFN_DIM) f32
    wff2_ref, bff2_ref,                      # (L, FFN_DIM, DIM) bf16 / (L, 1, DIM) f32
    ln2_g_ref, ln2_b_ref,                    # (L, 1, DIM) f32
    # regression head
    w1_ref, b1_ref,                          # (DIM, HEAD_HIDDEN) f32 / (1, HEAD_HIDDEN) f32
    w2_ref, b2_ref,                          # (1, HEAD_HIDDEN) f32 (torch (out,in) layout) / (1, 1) f32
    # output
    o_ref,                                   # (1, 1) f32
):
    mask = mask_ref[...]                     # (1, S)
    neg = jnp.finfo(jnp.float32).min

    # --- embedding LayerNorm (fused; no HBM round-trip of the (S, DIM) tile) ---
    x = _ln_f32(x_ref[...], emb_g_ref[...], emb_b_ref[...])       # (S, DIM) f32

    for l in range(N_LAYERS):
        # ---- fused QKV projection: one (S,D)@(D,3D) bf16 MXU push (192 lanes) ----
        qkv = jnp.dot(x.astype(jnp.bfloat16), wqkv_ref[l],
                      preferred_element_type=jnp.float32) + bqkv_ref[l]   # (S, 3D) f32

        wo = wo_ref[l]                                                     # (DIM, DIM) bf16
        attn = None
        for h in range(N_HEADS):
            lo = h * HEAD_DIM
            q_h = qkv[:, lo:lo + HEAD_DIM]                 # (S, HD); 1/sqrt(HD) folded in wq/bq
            k_h = qkv[:, DIM + lo:DIM + lo + HEAD_DIM]
            v_h = qkv[:, 2 * DIM + lo:2 * DIM + lo + HEAD_DIM]

            s_h = jnp.einsum("qd,kd->qk", q_h, k_h,
                             preferred_element_type=jnp.float32)           # (S, S)
            s_h = jnp.where(mask > 0.5, s_h, neg)                          # key-side padding mask
            m = jnp.max(s_h, axis=-1, keepdims=True)
            e = jnp.exp(s_h - m)                                           # f32 softmax
            p = e * pl.reciprocal(jnp.sum(e, axis=-1, keepdims=True), approx=True)
            # attention dropout is identity at eval
            ctx_h = jnp.dot(p, v_h, preferred_element_type=jnp.float32)    # (S, HD)

            # output projection distributed over heads: ctx_h @ wo[h*HD:(h+1)*HD, :]
            # (avoids a lane-concatenate of 16-wide head outputs)
            part = jnp.dot(ctx_h.astype(jnp.bfloat16), wo[lo:lo + HEAD_DIM, :],
                           preferred_element_type=jnp.float32)             # (S, DIM)
            attn = part if attn is None else attn + part
        attn = attn + bo_ref[l]

        # ---- residual + LayerNorm fused as matmul epilogue ----
        x = _ln_f32(attn + x, ln1_g_ref[l], ln1_b_ref[l])

        # ---- FFN ----
        # TODO(synk): DistilBERT uses exact erf-GELU; tanh approximation used here.
        ff = jnp.dot(x.astype(jnp.bfloat16), wff1_ref[l],
                     preferred_element_type=jnp.float32) + bff1_ref[l]     # (S, FFN_DIM)
        ff = jax.nn.gelu(ff, approximate=True)
        ff = jnp.dot(ff.astype(jnp.bfloat16), wff2_ref[l],
                     preferred_element_type=jnp.float32) + bff2_ref[l]     # (S, DIM)
        x = _ln_f32(ff + x, ln2_g_ref[l], ln2_b_ref[l])

    # --- regression head, fully in-kernel (the (1,DIM)/(1,32) intermediates never hit HBM) ---
    # NOTE: matches torch.mean over the full sequence (includes padded positions), as in the spec.
    rep = jnp.mean(x, axis=0, keepdims=True)                               # (1, DIM)
    h1 = jnp.dot(rep, w1_ref[...], preferred_element_type=jnp.float32) + b1_ref[...]
    h1 = jnp.maximum(h1, 0.0)                                              # ReLU
    # dropout(p=0.1) is identity at inference
    y = jnp.sum(h1 * w2_ref[...], axis=-1, keepdims=True) + b2_ref[...]    # (1, 1) via VPU reduce
    o_ref[...] = jax.nn.sigmoid(y).astype(o_ref.dtype)


# --------------------------- parameters ---------------------------

def init_params(key):
    keys = iter(jax.random.split(key, 8 + N_LAYERS * 12))

    def norm(shape, scale=0.02):
        return scale * jax.random.normal(next(keys), shape, dtype=jnp.float32)

    params = {
        "word_emb": norm((VOCAB, DIM)),
        "pos_emb": norm((MAX_POS, DIM)),
        "emb_ln_g": jnp.ones((1, DIM), jnp.float32),
        "emb_ln_b": jnp.zeros((1, DIM), jnp.float32),
        "layers": [],
        "w1": norm((DIM, HEAD_HIDDEN)),
        "b1": norm((1, HEAD_HIDDEN)),
        "w2": norm((HEAD_HIDDEN, 1)),
        "b2": norm((1, 1)),
    }
    for _ in range(N_LAYERS):
        params["layers"].append(dict(
            wq=norm((DIM, DIM)), bq=norm((1, DIM)),
            wk=norm((DIM, DIM)), bk=norm((1, DIM)),
            wv=norm((DIM, DIM)), bv=norm((1, DIM)),
            wo=norm((DIM, DIM)), bo=norm((1, DIM)),
            ln1_g=jnp.ones((1, DIM), jnp.float32), ln1_b=jnp.zeros((1, DIM), jnp.float32),
            w_ff1=norm((DIM, FFN_DIM)), b_ff1=norm((1, FFN_DIM)),
            w_ff2=norm((FFN_DIM, DIM)), b_ff2=norm((1, DIM)),
            ln2_g=jnp.ones((1, DIM), jnp.float32), ln2_b=jnp.zeros((1, DIM), jnp.float32),
        ))
    return params


def prepare_params(p):
    """Stack per-layer weights, fuse QKV, fold attention scale, cast matmul weights to bf16."""
    scale = 1.0 / (HEAD_DIM ** 0.5)

    def stack(name):
        return jnp.stack([lyr[name] for lyr in p["layers"]])

    wqkv = jnp.concatenate([stack("wq") * scale, stack("wk"), stack("wv")], axis=-1)
    bqkv = jnp.concatenate([stack("bq") * scale, stack("bk"), stack("bv")], axis=-1)
    return dict(
        word_emb=p["word_emb"], pos_emb=p["pos_emb"],
        emb_ln_g=p["emb_ln_g"], emb_ln_b=p["emb_ln_b"],
        wqkv=wqkv.astype(jnp.bfloat16), bqkv=bqkv,                    # (L, D, 3D) / (L, 1, 3D)
        wo=stack("wo").astype(jnp.bfloat16), bo=stack("bo"),
        ln1_g=stack("ln1_g"), ln1_b=stack("ln1_b"),
        wff1=stack("w_ff1").astype(jnp.bfloat16), bff1=stack("b_ff1"),
        wff2=stack("w_ff2").astype(jnp.bfloat16), bff2=stack("b_ff2"),
        ln2_g=stack("ln2_g"), ln2_b=stack("ln2_b"),
        w1=p["w1"], b1=p["b1"],
        w2=p["w2"].T,                                                 # (1, HEAD_HIDDEN)
        b2=p["b2"],
    )


# --------------------------- forward ---------------------------

def forward(prep, input_ids, attention_mask):
    b, s = input_ids.shape
    # embedding gathers are glue (token-id indexed); everything after is one fused kernel
    x = prep["word_emb"][input_ids] + prep["pos_emb"][:s][None, :, :]     # (B, S, DIM) f32
    mask = attention_mask.astype(jnp.float32).reshape(b, 1, s)            # (B, 1, S)

    def full(shape):
        nd = len(shape)
        return pl.BlockSpec(shape, lambda i: (0,) * nd)

    out = pl.pallas_call(
        _fused_forward_kernel,
        out_shape=jax.ShapeDtypeStruct((b, 1, 1), jnp.float32),
        grid=(b,),
        in_specs=[
            pl.BlockSpec((None, s, DIM), lambda i: (i, 0, 0)),            # x   (per-example)
            pl.BlockSpec((None, 1, s), lambda i: (i, 0, 0)),              # mask(per-example)
            full((1, DIM)), full((1, DIM)),                               # emb LN
            full((N_LAYERS, DIM, 3 * DIM)), full((N_LAYERS, 1, 3 * DIM)),  # wqkv / bqkv
            full((N_LAYERS, DIM, DIM)), full((N_LAYERS, 1, DIM)),          # wo / bo
            full((N_LAYERS, 1, DIM)), full((N_LAYERS, 1, DIM)),            # ln1
            full((N_LAYERS, DIM, FFN_DIM)), full((N_LAYERS, 1, FFN_DIM)),  # ff1
            full((N_LAYERS, FFN_DIM, DIM)), full((N_LAYERS, 1, DIM)),      # ff2
            full((N_LAYERS, 1, DIM)), full((N_LAYERS, 1, DIM)),            # ln2
            full((DIM, HEAD_HIDDEN)), full((1, HEAD_HIDDEN)),              # dense1
            full((1, HEAD_HIDDEN)), full((1, 1)),                          # dense2
        ],
        out_specs=pl.BlockSpec((None, 1, 1), lambda i: (i, 0, 0)),
        compiler_params=pltpu.CompilerParams(
            dimension_semantics=("parallel",)),                            # shard batch on v7x cores
    )(
        x, mask, prep["emb_ln_g"], prep["emb_ln_b"],
        prep["wqkv"], prep["bqkv"], prep["wo"], prep["bo"],
        prep["ln1_g"], prep["ln1_b"],
        prep["wff1"], prep["bff1"], prep["wff2"], prep["bff2"],
        prep["ln2_g"], prep["ln2_b"],
        prep["w1"], prep["b1"], prep["w2"], prep["b2"],
    )
    return out.reshape(b)                                                  # == .squeeze()


if __name__ == "__main__":
    key = jax.random.PRNGKey(0)
    k_param, k_ids = jax.random.split(key)
    params = init_params(k_param)
    prep = prepare_params(params)

    input_ids = jax.random.randint(k_ids, (B, S), 0, VOCAB, dtype=jnp.int32)
    attention_mask = jnp.ones((B, S), dtype=jnp.int32)
    attention_mask = attention_mask.at[1, 6:].set(0)                       # some padding

    fwd = jax.jit(forward)
    out = fwd(prep, input_ids, attention_mask)
    jax.block_until_ready(out)
    assert out.shape == (B,)
    assert bool(jnp.all((out >= 0.0) & (out <= 1.0)))
    assert bool(jnp.all(jnp.isfinite(out)))
    print("KERNEL_OK")
</pallas_src>

<mosaic_0001>
module attributes {stable_mosaic.version = 11 : i64} {
  func.func @_fused_forward_kernel(%arg0: i32, %arg1: memref<1x8x64xf32, #tpu.memory_space<vmem>>, %arg2: memref<1x1x8xf32, #tpu.memory_space<vmem>>, %arg3: memref<1x64xf32, #tpu.memory_space<vmem>>, %arg4: memref<1x64xf32, #tpu.memory_space<vmem>>, %arg5: memref<2x64x192xbf16, #tpu.memory_space<vmem>>, %arg6: memref<2x1x192xf32, #tpu.memory_space<vmem>>, %arg7: memref<2x64x64xbf16, #tpu.memory_space<vmem>>, %arg8: memref<2x1x64xf32, #tpu.memory_space<vmem>>, %arg9: memref<2x1x64xf32, #tpu.memory_space<vmem>>, %arg10: memref<2x1x64xf32, #tpu.memory_space<vmem>>, %arg11: memref<2x64x128xbf16, #tpu.memory_space<vmem>>, %arg12: memref<2x1x128xf32, #tpu.memory_space<vmem>>, %arg13: memref<2x128x64xbf16, #tpu.memory_space<vmem>>, %arg14: memref<2x1x64xf32, #tpu.memory_space<vmem>>, %arg15: memref<2x1x64xf32, #tpu.memory_space<vmem>>, %arg16: memref<2x1x64xf32, #tpu.memory_space<vmem>>, %arg17: memref<64x32xf32, #tpu.memory_space<vmem>>, %arg18: memref<1x32xf32, #tpu.memory_space<vmem>>, %arg19: memref<1x32xf32, #tpu.memory_space<vmem>>, %arg20: memref<1x1xf32, #tpu.memory_space<vmem>>, %arg21: memref<1x1x1xf32, #tpu.memory_space<vmem>>) attributes {dimension_semantics = [#tpu.dimension_semantics<parallel>], iteration_bounds = array<i64: 2>, scalar_prefetch = 0 : i64, scratch_operands = 0 : i64, tpu.core_type = #tpu.core_type<tc>, window_params = [{transform_indices = @transform_0, window_bounds = array<i64: 1, 8, 64>}, {transform_indices = @transform_1, window_bounds = array<i64: 1, 1, 8>}, {pipeline_mode = #tpu.pipeline_mode<synchronous>, transform_indices = @transform_2, window_bounds = array<i64: 1, 64>}, {pipeline_mode = #tpu.pipeline_mode<synchronous>, transform_indices = @transform_3, window_bounds = array<i64: 1, 64>}, {pipeline_mode = #tpu.pipeline_mode<synchronous>, transform_indices = @transform_4, window_bounds = array<i64: 2, 64, 192>}, {pipeline_mode = #tpu.pipeline_mode<synchronous>, transform_indices = @transform_5, window_bounds = array<i64: 2, 1, 192>}, {pipeline_mode = #tpu.pipeline_mode<synchronous>, transform_indices = @transform_6, window_bounds = array<i64: 2, 64, 64>}, {pipeline_mode = #tpu.pipeline_mode<synchronous>, transform_indices = @transform_7, window_bounds = array<i64: 2, 1, 64>}, {pipeline_mode = #tpu.pipeline_mode<synchronous>, transform_indices = @transform_8, window_bounds = array<i64: 2, 1, 64>}, {pipeline_mode = #tpu.pipeline_mode<synchronous>, transform_indices = @transform_9, window_bounds = array<i64: 2, 1, 64>}, {pipeline_mode = #tpu.pipeline_mode<synchronous>, transform_indices = @transform_10, window_bounds = array<i64: 2, 64, 128>}, {pipeline_mode = #tpu.pipeline_mode<synchronous>, transform_indices = @transform_11, window_bounds = array<i64: 2, 1, 128>}, {pipeline_mode = #tpu.pipeline_mode<synchronous>, transform_indices = @transform_12, window_bounds = array<i64: 2, 128, 64>}, {pipeline_mode = #tpu.pipeline_mode<synchronous>, transform_indices = @transform_13, window_bounds = array<i64: 2, 1, 64>}, {pipeline_mode = #tpu.pipeline_mode<synchronous>, transform_indices = @transform_14, window_bounds = array<i64: 2, 1, 64>}, {pipeline_mode = #tpu.pipeline_mode<synchronous>, transform_indices = @transform_15, window_bounds = array<i64: 2, 1, 64>}, {pipeline_mode = #tpu.pipeline_mode<synchronous>, transform_indices = @transform_16, window_bounds = array<i64: 64, 32>}, {pipeline_mode = #tpu.pipeline_mode<synchronous>, transform_indices = @transform_17, window_bounds = array<i64: 1, 32>}, {pipeline_mode = #tpu.pipeline_mode<synchronous>, transform_indices = @transform_18, window_bounds = array<i64: 1, 32>}, {pipeline_mode = #tpu.pipeline_mode<synchronous>, transform_indices = @transform_19, window_bounds = array<i64: 1, 1>}, {transform_indices = @transform_20, window_bounds = array<i64: 1, 1, 1>}]} {
    %c0 = arith.constant 0 : index
    %c0_0 = arith.constant 0 : index
    %c0_1 = arith.constant 0 : index
    %0 = vector.load %arg2[%c0, %c0_0, %c0_1] : memref<1x1x8xf32, #tpu.memory_space<vmem>>, vector<1x1x8xf32>
    %1 = vector.shape_cast %0 : vector<1x1x8xf32> to vector<1x8xf32>
    %c0_2 = arith.constant 0 : index
    %c0_3 = arith.constant 0 : index
    %c0_4 = arith.constant 0 : index
    %2 = vector.load %arg1[%c0_2, %c0_3, %c0_4] : memref<1x8x64xf32, #tpu.memory_space<vmem>>, vector<1x8x64xf32>
    %3 = vector.shape_cast %2 : vector<1x8x64xf32> to vector<8x64xf32>
    %c0_5 = arith.constant 0 : index
    %c0_6 = arith.constant 0 : index
    %4 = vector.load %arg3[%c0_5, %c0_6] : memref<1x64xf32, #tpu.memory_space<vmem>>, vector<1x64xf32>
    %c0_7 = arith.constant 0 : index
    %c0_8 = arith.constant 0 : index
    %5 = vector.load %arg4[%c0_7, %c0_8] : memref<1x64xf32, #tpu.memory_space<vmem>>, vector<1x64xf32>
    %cst = arith.constant dense<0.000000e+00> : vector<8xf32>
    %6 = vector.multi_reduction <add>, %3, %cst [1] : vector<8x64xf32> to vector<8xf32>
    %7 = vector.shape_cast %6 : vector<8xf32> to vector<8x1xf32>
    %cst_9 = arith.constant 6.400000e+01 : f32
    %8 = vector.broadcast %cst_9 : f32 to vector<8x1xf32>
    %9 = arith.divf %7, %8 : vector<8x1xf32>
    %10 = vector.broadcast %9 : vector<8x1xf32> to vector<8x64xf32>
    %11 = arith.subf %3, %10 : vector<8x64xf32>
    %12 = arith.mulf %11, %11 : vector<8x64xf32>
    %cst_10 = arith.constant dense<0.000000e+00> : vector<8xf32>
    %13 = vector.multi_reduction <add>, %12, %cst_10 [1] : vector<8x64xf32> to vector<8xf32>
    %14 = vector.shape_cast %13 : vector<8xf32> to vector<8x1xf32>
    %cst_11 = arith.constant 6.400000e+01 : f32
    %15 = vector.broadcast %cst_11 : f32 to vector<8x1xf32>
    %16 = arith.divf %14, %15 : vector<8x1xf32>
    %cst_12 = arith.constant 9.99999996E-13 : f32
    %17 = vector.broadcast %cst_12 : f32 to vector<8x1xf32>
    %18 = arith.addf %16, %17 : vector<8x1xf32>
    %19 = math.rsqrt %18 : vector<8x1xf32>
    %20 = vector.broadcast %19 : vector<8x1xf32> to vector<8x64xf32>
    %21 = arith.mulf %11, %20 : vector<8x64xf32>
    %22 = vector.broadcast %4 : vector<1x64xf32> to vector<8x64xf32>
    %23 = arith.mulf %21, %22 : vector<8x64xf32>
    %24 = vector.broadcast %5 : vector<1x64xf32> to vector<8x64xf32>
    %25 = arith.addf %23, %24 : vector<8x64xf32>
    %26 = arith.truncf %25 : vector<8x64xf32> to vector<8x64xbf16>
    %c0_13 = arith.constant 0 : index
    %c0_14 = arith.constant 0 : index
    %c0_15 = arith.constant 0 : index
    %27 = vector.load %arg5[%c0_13, %c0_14, %c0_15] : memref<2x64x192xbf16, #tpu.memory_space<vmem>>, vector<1x64x192xbf16>
    %28 = vector.shape_cast %27 : vector<1x64x192xbf16> to vector<64x192xbf16>
    %cst_16 = arith.constant dense<0.000000e+00> : vector<8x192xf32>
    %29 = tpu.matmul %26, %28, %cst_16 {dimension_numbers = #tpu.dot_dimension_numbers<[1], [0], [0], [1], [0, 0, 1, 1], [], []>} : vector<8x64xbf16>, vector<64x192xbf16>, vector<8x192xf32> -> vector<8x192xf32>
    %c0_17 = arith.constant 0 : index
    %c0_18 = arith.constant 0 : index
    %c0_19 = arith.constant 0 : index
    %30 = vector.load %arg6[%c0_17, %c0_18, %c0_19] : memref<2x1x192xf32, #tpu.memory_space<vmem>>, vector<1x1x192xf32>
    %31 = vector.shape_cast %30 : vector<1x1x192xf32> to vector<1x192xf32>
    %32 = vector.broadcast %31 : vector<1x192xf32> to vector<8x192xf32>
    %33 = arith.addf %29, %32 : vector<8x192xf32>
    %c0_20 = arith.constant 0 : index
    %c0_21 = arith.constant 0 : index
    %c0_22 = arith.constant 0 : index
    %34 = vector.load %arg7[%c0_20, %c0_21, %c0_22] : memref<2x64x64xbf16, #tpu.memory_space<vmem>>, vector<1x64x64xbf16>
    %35 = vector.shape_cast %34 : vector<1x64x64xbf16> to vector<64x64xbf16>
    %36 = vector.extract_strided_slice %33 {offsets = [0, 0], sizes = [8, 16], strides = [1, 1]} : vector<8x192xf32> to vector<8x16xf32>
    %37 = vector.extract_strided_slice %33 {offsets = [0, 64], sizes = [8, 16], strides = [1, 1]} : vector<8x192xf32> to vector<8x16xf32>
    %38 = vector.extract_strided_slice %33 {offsets = [0, 128], sizes = [8, 16], strides = [1, 1]} : vector<8x192xf32> to vector<8x16xf32>
    "tpu.trace_start"() <{level = 10 : i32, message = "qd,kd->qk"}> : () -> ()
    %cst_23 = arith.constant dense<0.000000e+00> : vector<8x8xf32>
    %39 = tpu.matmul %36, %37, %cst_23 {dimension_numbers = #tpu.dot_dimension_numbers<[1], [1], [0], [0], [0, 0, 1, 0], [], []>} : vector<8x16xf32>, vector<8x16xf32>, vector<8x8xf32> -> vector<8x8xf32>
    %cst_24 = arith.constant 5.000000e-01 : f32
    "tpu.trace_stop"() : () -> ()
    %40 = vector.broadcast %cst_24 : f32 to vector<1x8xf32>
    %41 = arith.cmpf ogt, %1, %40 : vector<1x8xf32>
    %cst_25 = arith.constant -3.40282347E+38 : f32
    %42 = vector.shape_cast %41 : vector<1x8xi1> to vector<1x8xi1>
    %43 = vector.broadcast %42 : vector<1x8xi1> to vector<8x8xi1>
    %44 = vector.broadcast %cst_25 : f32 to vector<8x8xf32>
    %45 = arith.select %43, %39, %44 : vector<8x8xi1>, vector<8x8xf32>
    %cst_26 = arith.constant dense<0xFF800000> : vector<8xf32>
    %46 = vector.multi_reduction <maximumf>, %45, %cst_26 [1] : vector<8x8xf32> to vector<8xf32>
    %47 = vector.shape_cast %46 : vector<8xf32> to vector<8x1xf32>
    %48 = vector.broadcast %47 : vector<8x1xf32> to vector<8x8xf32>
    %49 = arith.subf %45, %48 : vector<8x8xf32>
    %50 = math.exp %49 : vector<8x8xf32>
    %cst_27 = arith.constant dense<0.000000e+00> : vector<8xf32>
    %51 = vector.multi_reduction <add>, %50, %cst_27 [1] : vector<8x8xf32> to vector<8xf32>
    %52 = vector.shape_cast %51 : vector<8xf32> to vector<8x1xf32>
    %53 = tpu.reciprocal %52 {approx = true} : vector<8x1xf32> -> vector<8x1xf32>
    %54 = vector.broadcast %53 : vector<8x1xf32> to vector<8x8xf32>
    %55 = arith.mulf %50, %54 : vector<8x8xf32>
    %cst_28 = arith.constant dense<0.000000e+00> : vector<8x16xf32>
    %56 = tpu.matmul %55, %38, %cst_28 {dimension_numbers = #tpu.dot_dimension_numbers<[1], [0], [0], [1], [0, 0, 1, 1], [], []>} : vector<8x8xf32>, vector<8x16xf32>, vector<8x16xf32> -> vector<8x16xf32>
    %57 = arith.truncf %56 : vector<8x16xf32> to vector<8x16xbf16>
    %58 = vector.extract_strided_slice %35 {offsets = [0, 0], sizes = [16, 64], strides = [1, 1]} : vector<64x64xbf16> to vector<16x64xbf16>
    %cst_29 = arith.constant dense<0.000000e+00> : vector<8x64xf32>
    %59 = tpu.matmul %57, %58, %cst_29 {dimension_numbers = #tpu.dot_dimension_numbers<[1], [0], [0], [1], [0, 0, 1, 1], [], []>} : vector<8x16xbf16>, vector<16x64xbf16>, vector<8x64xf32> -> vector<8x64xf32>
    %60 = vector.extract_strided_slice %33 {offsets = [0, 16], sizes = [8, 16], strides = [1, 1]} : vector<8x192xf32> to vector<8x16xf32>
    %61 = vector.extract_strided_slice %33 {offsets = [0, 80], sizes = [8, 16], strides = [1, 1]} : vector<8x192xf32> to vector<8x16xf32>
    %62 = vector.extract_strided_slice %33 {offsets = [0, 144], sizes = [8, 16], strides = [1, 1]} : vector<8x192xf32> to vector<8x16xf32>
    "tpu.trace_start"() <{level = 10 : i32, message = "qd,kd->qk"}> : () -> ()
    %cst_30 = arith.constant dense<0.000000e+00> : vector<8x8xf32>
    %63 = tpu.matmul %60, %61, %cst_30 {dimension_numbers = #tpu.dot_dimension_numbers<[1], [1], [0], [0], [0, 0, 1, 0], [], []>} : vector<8x16xf32>, vector<8x16xf32>, vector<8x8xf32> -> vector<8x8xf32>
    %cst_31 = arith.constant 5.000000e-01 : f32
    "tpu.trace_stop"() : () -> ()
    %64 = vector.broadcast %cst_31 : f32 to vector<1x8xf32>
    %65 = arith.cmpf ogt, %1, %64 : vector<1x8xf32>
    %cst_32 = arith.constant -3.40282347E+38 : f32
    %66 = vector.shape_cast %65 : vector<1x8xi1> to vector<1x8xi1>
    %67 = vector.broadcast %66 : vector<1x8xi1> to vector<8x8xi1>
    %68 = vector.broadcast %cst_32 : f32 to vector<8x8xf32>
    %69 = arith.select %67, %63, %68 : vector<8x8xi1>, vector<8x8xf32>
    %cst_33 = arith.constant dense<0xFF800000> : vector<8xf32>
    %70 = vector.multi_reduction <maximumf>, %69, %cst_33 [1] : vector<8x8xf32> to vector<8xf32>
    %71 = vector.shape_cast %70 : vector<8xf32> to vector<8x1xf32>
    %72 = vector.broadcast %71 : vector<8x1xf32> to vector<8x8xf32>
    %73 = arith.subf %69, %72 : vector<8x8xf32>
    %74 = math.exp %73 : vector<8x8xf32>
    %cst_34 = arith.constant dense<0.000000e+00> : vector<8xf32>
    %75 = vector.multi_reduction <add>, %74, %cst_34 [1] : vector<8x8xf32> to vector<8xf32>
    %76 = vector.shape_cast %75 : vector<8xf32> to vector<8x1xf32>
    %77 = tpu.reciprocal %76 {approx = true} : vector<8x1xf32> -> vector<8x1xf32>
    %78 = vector.broadcast %77 : vector<8x1xf32> to vector<8x8xf32>
    %79 = arith.mulf %74, %78 : vector<8x8xf32>
    %cst_35 = arith.constant dense<0.000000e+00> : vector<8x16xf32>
    %80 = tpu.matmul %79, %62, %cst_35 {dimension_numbers = #tpu.dot_dimension_numbers<[1], [0], [0], [1], [0, 0, 1, 1], [], []>} : vector<8x8xf32>, vector<8x16xf32>, vector<8x16xf32> -> vector<8x16xf32>
    %81 = arith.truncf %80 : vector<8x16xf32> to vector<8x16xbf16>
    %82 = vector.extract_strided_slice %35 {offsets = [16, 0], sizes = [16, 64], strides = [1, 1]} : vector<64x64xbf16> to vector<16x64xbf16>
    %cst_36 = arith.constant dense<0.000000e+00> : vector<8x64xf32>
    %83 = tpu.matmul %81, %82, %cst_36 {dimension_numbers = #tpu.dot_dimension_numbers<[1], [0], [0], [1], [0, 0, 1, 1], [], []>} : vector<8x16xbf16>, vector<16x64xbf16>, vector<8x64xf32> -> vector<8x64xf32>
    %84 = arith.addf %59, %83 : vector<8x64xf32>
    %85 = vector.extract_strided_slice %33 {offsets = [0, 32], sizes = [8, 16], strides = [1, 1]} : vector<8x192xf32> to vector<8x16xf32>
    %86 = vector.extract_strided_slice %33 {offsets = [0, 96], sizes = [8, 16], strides = [1, 1]} : vector<8x192xf32> to vector<8x16xf32>
    %87 = vector.extract_strided_slice %33 {offsets = [0, 160], sizes = [8, 16], strides = [1, 1]} : vector<8x192xf32> to vector<8x16xf32>
    "tpu.trace_start"() <{level = 10 : i32, message = "qd,kd->qk"}> : () -> ()
    %cst_37 = arith.constant dense<0.000000e+00> : vector<8x8xf32>
    %88 = tpu.matmul %85, %86, %cst_37 {dimension_numbers = #tpu.dot_dimension_numbers<[1], [1], [0], [0], [0, 0, 1, 0], [], []>} : vector<8x16xf32>, vector<8x16xf32>, vector<8x8xf32> -> vector<8x8xf32>
    %cst_38 = arith.constant 5.000000e-01 : f32
    "tpu.trace_stop"() : () -> ()
    %89 = vector.broadcast %cst_38 : f32 to vector<1x8xf32>
    %90 = arith.cmpf ogt, %1, %89 : vector<1x8xf32>
    %cst_39 = arith.constant -3.40282347E+38 : f32
    %91 = vector.shape_cast %90 : vector<1x8xi1> to vector<1x8xi1>
    %92 = vector.broadcast %91 : vector<1x8xi1> to vector<8x8xi1>
    %93 = vector.broadcast %cst_39 : f32 to vector<8x8xf32>
    %94 = arith.select %92, %88, %93 : vector<8x8xi1>, vector<8x8xf32>
    %cst_40 = arith.constant dense<0xFF800000> : vector<8xf32>
    %95 = vector.multi_reduction <maximumf>, %94, %cst_40 [1] : vector<8x8xf32> to vector<8xf32>
    %96 = vector.shape_cast %95 : vector<8xf32> to vector<8x1xf32>
    %97 = vector.broadcast %96 : vector<8x1xf32> to vector<8x8xf32>
    %98 = arith.subf %94, %97 : vector<8x8xf32>
    %99 = math.exp %98 : vector<8x8xf32>
    %cst_41 = arith.constant dense<0.000000e+00> : vector<8xf32>
    %100 = vector.multi_reduction <add>, %99, %cst_41 [1] : vector<8x8xf32> to vector<8xf32>
    %101 = vector.shape_cast %100 : vector<8xf32> to vector<8x1xf32>
    %102 = tpu.reciprocal %101 {approx = true} : vector<8x1xf32> -> vector<8x1xf32>
    %103 = vector.broadcast %102 : vector<8x1xf32> to vector<8x8xf32>
    %104 = arith.mulf %99, %103 : vector<8x8xf32>
    %cst_42 = arith.constant dense<0.000000e+00> : vector<8x16xf32>
    %105 = tpu.matmul %104, %87, %cst_42 {dimension_numbers = #tpu.dot_dimension_numbers<[1], [0], [0], [1], [0, 0, 1, 1], [], []>} : vector<8x8xf32>, vector<8x16xf32>, vector<8x16xf32> -> vector<8x16xf32>
    %106 = arith.truncf %105 : vector<8x16xf32> to vector<8x16xbf16>
    %107 = vector.extract_strided_slice %35 {offsets = [32, 0], sizes = [16, 64], strides = [1, 1]} : vector<64x64xbf16> to vector<16x64xbf16>
    %cst_43 = arith.constant dense<0.000000e+00> : vector<8x64xf32>
    %108 = tpu.matmul %106, %107, %cst_43 {dimension_numbers = #tpu.dot_dimension_numbers<[1], [0], [0], [1], [0, 0, 1, 1], [], []>} : vector<8x16xbf16>, vector<16x64xbf16>, vector<8x64xf32> -> vector<8x64xf32>
    %109 = arith.addf %84, %108 : vector<8x64xf32>
    %110 = vector.extract_strided_slice %33 {offsets = [0, 48], sizes = [8, 16], strides = [1, 1]} : vector<8x192xf32> to vector<8x16xf32>
    %111 = vector.extract_strided_slice %33 {offsets = [0, 112], sizes = [8, 16], strides = [1, 1]} : vector<8x192xf32> to vector<8x16xf32>
    %112 = vector.extract_strided_slice %33 {offsets = [0, 176], sizes = [8, 16], strides = [1, 1]} : vector<8x192xf32> to vector<8x16xf32>
    "tpu.trace_start"() <{level = 10 : i32, message = "qd,kd->qk"}> : () -> ()
    %cst_44 = arith.constant dense<0.000000e+00> : vector<8x8xf32>
    %113 = tpu.matmul %110, %111, %cst_44 {dimension_numbers = #tpu.dot_dimension_numbers<[1], [1], [0], [0], [0, 0, 1, 0], [], []>} : vector<8x16xf32>, vector<8x16xf32>, vector<8x8xf32> -> vector<8x8xf32>
    %cst_45 = arith.constant 5.000000e-01 : f32
    "tpu.trace_stop"() : () -> ()
    %114 = vector.broadcast %cst_45 : f32 to vector<1x8xf32>
    %115 = arith.cmpf ogt, %1, %114 : vector<1x8xf32>
    %cst_46 = arith.constant -3.40282347E+38 : f32
    %116 = vector.shape_cast %115 : vector<1x8xi1> to vector<1x8xi1>
    %117 = vector.broadcast %116 : vector<1x8xi1> to vector<8x8xi1>
    %118 = vector.broadcast %cst_46 : f32 to vector<8x8xf32>
    %119 = arith.select %117, %113, %118 : vector<8x8xi1>, vector<8x8xf32>
    %cst_47 = arith.constant dense<0xFF800000> : vector<8xf32>
    %120 = vector.multi_reduction <maximumf>, %119, %cst_47 [1] : vector<8x8xf32> to vector<8xf32>
    %121 = vector.shape_cast %120 : vector<8xf32> to vector<8x1xf32>
    %122 = vector.broadcast %121 : vector<8x1xf32> to vector<8x8xf32>
    %123 = arith.subf %119, %122 : vector<8x8xf32>
    %124 = math.exp %123 : vector<8x8xf32>
    %cst_48 = arith.constant dense<0.000000e+00> : vector<8xf32>
    %125 = vector.multi_reduction <add>, %124, %cst_48 [1] : vector<8x8xf32> to vector<8xf32>
    %126 = vector.shape_cast %125 : vector<8xf32> to vector<8x1xf32>
    %127 = tpu.reciprocal %126 {approx = true} : vector<8x1xf32> -> vector<8x1xf32>
    %128 = vector.broadcast %127 : vector<8x1xf32> to vector<8x8xf32>
    %129 = arith.mulf %124, %128 : vector<8x8xf32>
    %cst_49 = arith.constant dense<0.000000e+00> : vector<8x16xf32>
    %130 = tpu.matmul %129, %112, %cst_49 {dimension_numbers = #tpu.dot_dimension_numbers<[1], [0], [0], [1], [0, 0, 1, 1], [], []>} : vector<8x8xf32>, vector<8x16xf32>, vector<8x16xf32> -> vector<8x16xf32>
    %131 = arith.truncf %130 : vector<8x16xf32> to vector<8x16xbf16>
    %132 = vector.extract_strided_slice %35 {offsets = [48, 0], sizes = [16, 64], strides = [1, 1]} : vector<64x64xbf16> to vector<16x64xbf16>
    %cst_50 = arith.constant dense<0.000000e+00> : vector<8x64xf32>
    %133 = tpu.matmul %131, %132, %cst_50 {dimension_numbers = #tpu.dot_dimension_numbers<[1], [0], [0], [1], [0, 0, 1, 1], [], []>} : vector<8x16xbf16>, vector<16x64xbf16>, vector<8x64xf32> -> vector<8x64xf32>
    %134 = arith.addf %109, %133 : vector<8x64xf32>
    %c0_51 = arith.constant 0 : index
    %c0_52 = arith.constant 0 : index
    %c0_53 = arith.constant 0 : index
    %135 = vector.load %arg8[%c0_51, %c0_52, %c0_53] : memref<2x1x64xf32, #tpu.memory_space<vmem>>, vector<1x1x64xf32>
    %136 = vector.shape_cast %135 : vector<1x1x64xf32> to vector<1x64xf32>
    %137 = vector.broadcast %136 : vector<1x64xf32> to vector<8x64xf32>
    %138 = arith.addf %134, %137 : vector<8x64xf32>
    %139 = arith.addf %138, %25 : vector<8x64xf32>
    %c0_54 = arith.constant 0 : index
    %c0_55 = arith.constant 0 : index
    %c0_56 = arith.constant 0 : index
    %140 = vector.load %arg9[%c0_54, %c0_55, %c0_56] : memref<2x1x64xf32, #tpu.memory_space<vmem>>, vector<1x1x64xf32>
    %141 = vector.shape_cast %140 : vector<1x1x64xf32> to vector<1x64xf32>
    %c0_57 = arith.constant 0 : index
    %c0_58 = arith.constant 0 : index
    %c0_59 = arith.constant 0 : index
    %142 = vector.load %arg10[%c0_57, %c0_58, %c0_59] : memref<2x1x64xf32, #tpu.memory_space<vmem>>, vector<1x1x64xf32>
    %143 = vector.shape_cast %142 : vector<1x1x64xf32> to vector<1x64xf32>
    %cst_60 = arith.constant dense<0.000000e+00> : vector<8xf32>
    %144 = vector.multi_reduction <add>, %139, %cst_60 [1] : vector<8x64xf32> to vector<8xf32>
    %145 = vector.shape_cast %144 : vector<8xf32> to vector<8x1xf32>
    %cst_61 = arith.constant 6.400000e+01 : f32
    %146 = vector.broadcast %cst_61 : f32 to vector<8x1xf32>
    %147 = arith.divf %145, %146 : vector<8x1xf32>
    %148 = vector.broadcast %147 : vector<8x1xf32> to vector<8x64xf32>
    %149 = arith.subf %139, %148 : vector<8x64xf32>
    %150 = arith.mulf %149, %149 : vector<8x64xf32>
    %cst_62 = arith.constant dense<0.000000e+00> : vector<8xf32>
    %151 = vector.multi_reduction <add>, %150, %cst_62 [1] : vector<8x64xf32> to vector<8xf32>
    %152 = vector.shape_cast %151 : vector<8xf32> to vector<8x1xf32>
    %cst_63 = arith.constant 6.400000e+01 : f32
    %153 = vector.broadcast %cst_63 : f32 to vector<8x1xf32>
    %154 = arith.divf %152, %153 : vector<8x1xf32>
    %cst_64 = arith.constant 9.99999996E-13 : f32
    %155 = vector.broadcast %cst_64 : f32 to vector<8x1xf32>
    %156 = arith.addf %154, %155 : vector<8x1xf32>
    %157 = math.rsqrt %156 : vector<8x1xf32>
    %158 = vector.broadcast %157 : vector<8x1xf32> to vector<8x64xf32>
    %159 = arith.mulf %149, %158 : vector<8x64xf32>
    %160 = vector.broadcast %141 : vector<1x64xf32> to vector<8x64xf32>
    %161 = arith.mulf %159, %160 : vector<8x64xf32>
    %162 = vector.broadcast %143 : vector<1x64xf32> to vector<8x64xf32>
    %163 = arith.addf %161, %162 : vector<8x64xf32>
    %164 = arith.truncf %163 : vector<8x64xf32> to vector<8x64xbf16>
    %c0_65 = arith.constant 0 : index
    %c0_66 = arith.constant 0 : index
    %c0_67 = arith.constant 0 : index
    %165 = vector.load %arg11[%c0_65, %c0_66, %c0_67] : memref<2x64x128xbf16, #tpu.memory_space<vmem>>, vector<1x64x128xbf16>
    %166 = vector.shape_cast %165 : vector<1x64x128xbf16> to vector<64x128xbf16>
    %cst_68 = arith.constant dense<0.000000e+00> : vector<8x128xf32>
    %167 = tpu.matmul %164, %166, %cst_68 {dimension_numbers = #tpu.dot_dimension_numbers<[1], [0], [0], [1], [0, 0, 1, 1], [], []>} : vector<8x64xbf16>, vector<64x128xbf16>, vector<8x128xf32> -> vector<8x128xf32>
    %c0_69 = arith.constant 0 : index
    %c0_70 = arith.constant 0 : index
    %c0_71 = arith.constant 0 : index
    %168 = vector.load %arg12[%c0_69, %c0_70, %c0_71] : memref<2x1x128xf32, #tpu.memory_space<vmem>>, vector<1x1x128xf32>
    %169 = vector.shape_cast %168 : vector<1x1x128xf32> to vector<1x128xf32>
    %170 = vector.broadcast %169 : vector<1x128xf32> to vector<8x128xf32>
    %171 = arith.addf %167, %170 : vector<8x128xf32>
    %172 = arith.mulf %171, %171 : vector<8x128xf32>
    %173 = arith.mulf %171, %172 : vector<8x128xf32>
    %cst_72 = arith.constant 4.471500e-02 : f32
    %174 = vector.broadcast %cst_72 : f32 to vector<8x128xf32>
    %175 = arith.mulf %174, %173 : vector<8x128xf32>
    %176 = arith.addf %171, %175 : vector<8x128xf32>
    %cst_73 = arith.constant 0.797884583 : f32
    %177 = vector.broadcast %cst_73 : f32 to vector<8x128xf32>
    %178 = arith.mulf %177, %176 : vector<8x128xf32>
    %179 = math.tanh %178 : vector<8x128xf32>
    %cst_74 = arith.constant 1.000000e+00 : f32
    %180 = vector.broadcast %cst_74 : f32 to vector<8x128xf32>
    %181 = arith.addf %180, %179 : vector<8x128xf32>
    %cst_75 = arith.constant 5.000000e-01 : f32
    %182 = vector.broadcast %cst_75 : f32 to vector<8x128xf32>
    %183 = arith.mulf %182, %181 : vector<8x128xf32>
    %184 = arith.mulf %171, %183 : vector<8x128xf32>
    %185 = arith.truncf %184 : vector<8x128xf32> to vector<8x128xbf16>
    %c0_76 = arith.constant 0 : index
    %c0_77 = arith.constant 0 : index
    %c0_78 = arith.constant 0 : index
    %186 = vector.load %arg13[%c0_76, %c0_77, %c0_78] : memref<2x128x64xbf16, #tpu.memory_space<vmem>>, vector<1x128x64xbf16>
    %187 = vector.shape_cast %186 : vector<1x128x64xbf16> to vector<128x64xbf16>
    %cst_79 = arith.constant dense<0.000000e+00> : vector<8x64xf32>
    %188 = tpu.matmul %185, %187, %cst_79 {dimension_numbers = #tpu.dot_dimension_numbers<[1], [0], [0], [1], [0, 0, 1, 1], [], []>} : vector<8x128xbf16>, vector<128x64xbf16>, vector<8x64xf32> -> vector<8x64xf32>
    %c0_80 = arith.constant 0 : index
    %c0_81 = arith.constant 0 : index
    %c0_82 = arith.constant 0 : index
    %189 = vector.load %arg14[%c0_80, %c0_81, %c0_82] : memref<2x1x64xf32, #tpu.memory_space<vmem>>, vector<1x1x64xf32>
    %190 = vector.shape_cast %189 : vector<1x1x64xf32> to vector<1x64xf32>
    %191 = vector.broadcast %190 : vector<1x64xf32> to vector<8x64xf32>
    %192 = arith.addf %188, %191 : vector<8x64xf32>
    %193 = arith.addf %192, %163 : vector<8x64xf32>
    %c0_83 = arith.constant 0 : index
    %c0_84 = arith.constant 0 : index
    %c0_85 = arith.constant 0 : index
    %194 = vector.load %arg15[%c0_83, %c0_84, %c0_85] : memref<2x1x64xf32, #tpu.memory_space<vmem>>, vector<1x1x64xf32>
    %195 = vector.shape_cast %194 : vector<1x1x64xf32> to vector<1x64xf32>
    %c0_86 = arith.constant 0 : index
    %c0_87 = arith.constant 0 : index
    %c0_88 = arith.constant 0 : index
    %196 = vector.load %arg16[%c0_86, %c0_87, %c0_88] : memref<2x1x64xf32, #tpu.memory_space<vmem>>, vector<1x1x64xf32>
    %197 = vector.shape_cast %196 : vector<1x1x64xf32> to vector<1x64xf32>
    %cst_89 = arith.constant dense<0.000000e+00> : vector<8xf32>
    %198 = vector.multi_reduction <add>, %193, %cst_89 [1] : vector<8x64xf32> to vector<8xf32>
    %199 = vector.shape_cast %198 : vector<8xf32> to vector<8x1xf32>
    %cst_90 = arith.constant 6.400000e+01 : f32
    %200 = vector.broadcast %cst_90 : f32 to vector<8x1xf32>
    %201 = arith.divf %199, %200 : vector<8x1xf32>
    %202 = vector.broadcast %201 : vector<8x1xf32> to vector<8x64xf32>
    %203 = arith.subf %193, %202 : vector<8x64xf32>
    %204 = arith.mulf %203, %203 : vector<8x64xf32>
    %cst_91 = arith.constant dense<0.000000e+00> : vector<8xf32>
    %205 = vector.multi_reduction <add>, %204, %cst_91 [1] : vector<8x64xf32> to vector<8xf32>
    %206 = vector.shape_cast %205 : vector<8xf32> to vector<8x1xf32>
    %cst_92 = arith.constant 6.400000e+01 : f32
    %207 = vector.broadcast %cst_92 : f32 to vector<8x1xf32>
    %208 = arith.divf %206, %207 : vector<8x1xf32>
    %cst_93 = arith.constant 9.99999996E-13 : f32
    %209 = vector.broadcast %cst_93 : f32 to vector<8x1xf32>
    %210 = arith.addf %208, %209 : vector<8x1xf32>
    %211 = math.rsqrt %210 : vector<8x1xf32>
    %212 = vector.broadcast %211 : vector<8x1xf32> to vector<8x64xf32>
    %213 = arith.mulf %203, %212 : vector<8x64xf32>
    %214 = vector.broadcast %195 : vector<1x64xf32> to vector<8x64xf32>
    %215 = arith.mulf %213, %214 : vector<8x64xf32>
    %216 = vector.broadcast %197 : vector<1x64xf32> to vector<8x64xf32>
    %217 = arith.addf %215, %216 : vector<8x64xf32>
    %218 = arith.truncf %217 : vector<8x64xf32> to vector<8x64xbf16>
    %c1 = arith.constant 1 : index
    %c0_94 = arith.constant 0 : index
    %c0_95 = arith.constant 0 : index
    %219 = vector.load %arg5[%c1, %c0_94, %c0_95] : memref<2x64x192xbf16, #tpu.memory_space<vmem>>, vector<1x64x192xbf16>
    %220 = vector.shape_cast %219 : vector<1x64x192xbf16> to vector<64x192xbf16>
    %cst_96 = arith.constant dense<0.000000e+00> : vector<8x192xf32>
    %221 = tpu.matmul %218, %220, %cst_96 {dimension_numbers = #tpu.dot_dimension_numbers<[1], [0], [0], [1], [0, 0, 1, 1], [], []>} : vector<8x64xbf16>, vector<64x192xbf16>, vector<8x192xf32> -> vector<8x192xf32>
    %c1_97 = arith.constant 1 : index
    %c0_98 = arith.constant 0 : index
    %c0_99 = arith.constant 0 : index
    %222 = vector.load %arg6[%c1_97, %c0_98, %c0_99] : memref<2x1x192xf32, #tpu.memory_space<vmem>>, vector<1x1x192xf32>
    %223 = vector.shape_cast %222 : vector<1x1x192xf32> to vector<1x192xf32>
    %224 = vector.broadcast %223 : vector<1x192xf32> to vector<8x192xf32>
    %225 = arith.addf %221, %224 : vector<8x192xf32>
    %c1_100 = arith.constant 1 : index
    %c0_101 = arith.constant 0 : index
    %c0_102 = arith.constant 0 : index
    %226 = vector.load %arg7[%c1_100, %c0_101, %c0_102] : memref<2x64x64xbf16, #tpu.memory_space<vmem>>, vector<1x64x64xbf16>
    %227 = vector.shape_cast %226 : vector<1x64x64xbf16> to vector<64x64xbf16>
    %228 = vector.extract_strided_slice %225 {offsets = [0, 0], sizes = [8, 16], strides = [1, 1]} : vector<8x192xf32> to vector<8x16xf32>
    %229 = vector.extract_strided_slice %225 {offsets = [0, 64], sizes = [8, 16], strides = [1, 1]} : vector<8x192xf32> to vector<8x16xf32>
    %230 = vector.extract_strided_slice %225 {offsets = [0, 128], sizes = [8, 16], strides = [1, 1]} : vector<8x192xf32> to vector<8x16xf32>
    "tpu.trace_start"() <{level = 10 : i32, message = "qd,kd->qk"}> : () -> ()
    %cst_103 = arith.constant dense<0.000000e+00> : vector<8x8xf32>
    %231 = tpu.matmul %228, %229, %cst_103 {dimension_numbers = #tpu.dot_dimension_numbers<[1], [1], [0], [0], [0, 0, 1, 0], [], []>} : vector<8x16xf32>, vector<8x16xf32>, vector<8x8xf32> -> vector<8x8xf32>
    %cst_104 = arith.constant 5.000000e-01 : f32
    "tpu.trace_stop"() : () -> ()
    %232 = vector.broadcast %cst_104 : f32 to vector<1x8xf32>
    %233 = arith.cmpf ogt, %1, %232 : vector<1x8xf32>
    %cst_105 = arith.constant -3.40282347E+38 : f32
    %234 = vector.shape_cast %233 : vector<1x8xi1> to vector<1x8xi1>
    %235 = vector.broadcast %234 : vector<1x8xi1> to vector<8x8xi1>
    %236 = vector.broadcast %cst_105 : f32 to vector<8x8xf32>
    %237 = arith.select %235, %231, %236 : vector<8x8xi1>, vector<8x8xf32>
    %cst_106 = arith.constant dense<0xFF800000> : vector<8xf32>
    %238 = vector.multi_reduction <maximumf>, %237, %cst_106 [1] : vector<8x8xf32> to vector<8xf32>
    %239 = vector.shape_cast %238 : vector<8xf32> to vector<8x1xf32>
    %240 = vector.broadcast %239 : vector<8x1xf32> to vector<8x8xf32>
    %241 = arith.subf %237, %240 : vector<8x8xf32>
    %242 = math.exp %241 : vector<8x8xf32>
    %cst_107 = arith.constant dense<0.000000e+00> : vector<8xf32>
    %243 = vector.multi_reduction <add>, %242, %cst_107 [1] : vector<8x8xf32> to vector<8xf32>
    %244 = vector.shape_cast %243 : vector<8xf32> to vector<8x1xf32>
    %245 = tpu.reciprocal %244 {approx = true} : vector<8x1xf32> -> vector<8x1xf32>
    %246 = vector.broadcast %245 : vector<8x1xf32> to vector<8x8xf32>
    %247 = arith.mulf %242, %246 : vector<8x8xf32>
    %cst_108 = arith.constant dense<0.000000e+00> : vector<8x16xf32>
    %248 = tpu.matmul %247, %230, %cst_108 {dimension_numbers = #tpu.dot_dimension_numbers<[1], [0], [0], [1], [0, 0, 1, 1], [], []>} : vector<8x8xf32>, vector<8x16xf32>, vector<8x16xf32> -> vector<8x16xf32>
    %249 = arith.truncf %248 : vector<8x16xf32> to vector<8x16xbf16>
    %250 = vector.extract_strided_slice %227 {offsets = [0, 0], sizes = [16, 64], strides = [1, 1]} : vector<64x64xbf16> to vector<16x64xbf16>
    %cst_109 = arith.constant dense<0.000000e+00> : vector<8x64xf32>
    %251 = tpu.matmul %249, %250, %cst_109 {dimension_numbers = #tpu.dot_dimension_numbers<[1], [0], [0], [1], [0, 0, 1, 1], [], []>} : vector<8x16xbf16>, vector<16x64xbf16>, vector<8x64xf32> -> vector<8x64xf32>
    %252 = vector.extract_strided_slice %225 {offsets = [0, 16], sizes = [8, 16], strides = [1, 1]} : vector<8x192xf32> to vector<8x16xf32>
    %253 = vector.extract_strided_slice %225 {offsets = [0, 80], sizes = [8, 16], strides = [1, 1]} : vector<8x192xf32> to vector<8x16xf32>
    %254 = vector.extract_strided_slice %225 {offsets = [0, 144], sizes = [8, 16], strides = [1, 1]} : vector<8x192xf32> to vector<8x16xf32>
    "tpu.trace_start"() <{level = 10 : i32, message = "qd,kd->qk"}> : () -> ()
    %cst_110 = arith.constant dense<0.000000e+00> : vector<8x8xf32>
    %255 = tpu.matmul %252, %253, %cst_110 {dimension_numbers = #tpu.dot_dimension_numbers<[1], [1], [0], [0], [0, 0, 1, 0], [], []>} : vector<8x16xf32>, vector<8x16xf32>, vector<8x8xf32> -> vector<8x8xf32>
    %cst_111 = arith.constant 5.000000e-01 : f32
    "tpu.trace_stop"() : () -> ()
    %256 = vector.broadcast %cst_111 : f32 to vector<1x8xf32>
    %257 = arith.cmpf ogt, %1, %256 : vector<1x8xf32>
    %cst_112 = arith.constant -3.40282347E+38 : f32
    %258 = vector.shape_cast %257 : vector<1x8xi1> to vector<1x8xi1>
    %259 = vector.broadcast %258 : vector<1x8xi1> to vector<8x8xi1>
    %260 = vector.broadcast %cst_112 : f32 to vector<8x8xf32>
    %261 = arith.select %259, %255, %260 : vector<8x8xi1>, vector<8x8xf32>
    %cst_113 = arith.constant dense<0xFF800000> : vector<8xf32>
    %262 = vector.multi_reduction <maximumf>, %261, %cst_113 [1] : vector<8x8xf32> to vector<8xf32>
    %263 = vector.shape_cast %262 : vector<8xf32> to vector<8x1xf32>
    %264 = vector.broadcast %263 : vector<8x1xf32> to vector<8x8xf32>
    %265 = arith.subf %261, %264 : vector<8x8xf32>
    %266 = math.exp %265 : vector<8x8xf32>
    %cst_114 = arith.constant dense<0.000000e+00> : vector<8xf32>
    %267 = vector.multi_reduction <add>, %266, %cst_114 [1] : vector<8x8xf32> to vector<8xf32>
    %268 = vector.shape_cast %267 : vector<8xf32> to vector<8x1xf32>
    %269 = tpu.reciprocal %268 {approx = true} : vector<8x1xf32> -> vector<8x1xf32>
    %270 = vector.broadcast %269 : vector<8x1xf32> to vector<8x8xf32>
    %271 = arith.mulf %266, %270 : vector<8x8xf32>
    %cst_115 = arith.constant dense<0.000000e+00> : vector<8x16xf32>
    %272 = tpu.matmul %271, %254, %cst_115 {dimension_numbers = #tpu.dot_dimension_numbers<[1], [0], [0], [1], [0, 0, 1, 1], [], []>} : vector<8x8xf32>, vector<8x16xf32>, vector<8x16xf32> -> vector<8x16xf32>
    %273 = arith.truncf %272 : vector<8x16xf32> to vector<8x16xbf16>
    %274 = vector.extract_strided_slice %227 {offsets = [16, 0], sizes = [16, 64], strides = [1, 1]} : vector<64x64xbf16> to vector<16x64xbf16>
    %cst_116 = arith.constant dense<0.000000e+00> : vector<8x64xf32>
    %275 = tpu.matmul %273, %274, %cst_116 {dimension_numbers = #tpu.dot_dimension_numbers<[1], [0], [0], [1], [0, 0, 1, 1], [], []>} : vector<8x16xbf16>, vector<16x64xbf16>, vector<8x64xf32> -> vector<8x64xf32>
    %276 = arith.addf %251, %275 : vector<8x64xf32>
    %277 = vector.extract_strided_slice %225 {offsets = [0, 32], sizes = [8, 16], strides = [1, 1]} : vector<8x192xf32> to vector<8x16xf32>
    %278 = vector.extract_strided_slice %225 {offsets = [0, 96], sizes = [8, 16], strides = [1, 1]} : vector<8x192xf32> to vector<8x16xf32>
    %279 = vector.extract_strided_slice %225 {offsets = [0, 160], sizes = [8, 16], strides = [1, 1]} : vector<8x192xf32> to vector<8x16xf32>
    "tpu.trace_start"() <{level = 10 : i32, message = "qd,kd->qk"}> : () -> ()
    %cst_117 = arith.constant dense<0.000000e+00> : vector<8x8xf32>
    %280 = tpu.matmul %277, %278, %cst_117 {dimension_numbers = #tpu.dot_dimension_numbers<[1], [1], [0], [0], [0, 0, 1, 0], [], []>} : vector<8x16xf32>, vector<8x16xf32>, vector<8x8xf32> -> vector<8x8xf32>
    %cst_118 = arith.constant 5.000000e-01 : f32
    "tpu.trace_stop"() : () -> ()
    %281 = vector.broadcast %cst_118 : f32 to vector<1x8xf32>
    %282 = arith.cmpf ogt, %1, %281 : vector<1x8xf32>
    %cst_119 = arith.constant -3.40282347E+38 : f32
    %283 = vector.shape_cast %282 : vector<1x8xi1> to vector<1x8xi1>
    %284 = vector.broadcast %283 : vector<1x8xi1> to vector<8x8xi1>
    %285 = vector.broadcast %cst_119 : f32 to vector<8x8xf32>
    %286 = arith.select %284, %280, %285 : vector<8x8xi1>, vector<8x8xf32>
    %cst_120 = arith.constant dense<0xFF800000> : vector<8xf32>
    %287 = vector.multi_reduction <maximumf>, %286, %cst_120 [1] : vector<8x8xf32> to vector<8xf32>
    %288 = vector.shape_cast %287 : vector<8xf32> to vector<8x1xf32>
    %289 = vector.broadcast %288 : vector<8x1xf32> to vector<8x8xf32>
    %290 = arith.subf %286, %289 : vector<8x8xf32>
    %291 = math.exp %290 : vector<8x8xf32>
    %cst_121 = arith.constant dense<0.000000e+00> : vector<8xf32>
    %292 = vector.multi_reduction <add>, %291, %cst_121 [1] : vector<8x8xf32> to vector<8xf32>
    %293 = vector.shape_cast %292 : vector<8xf32> to vector<8x1xf32>
    %294 = tpu.reciprocal %293 {approx = true} : vector<8x1xf32> -> vector<8x1xf32>
    %295 = vector.broadcast %294 : vector<8x1xf32> to vector<8x8xf32>
    %296 = arith.mulf %291, %295 : vector<8x8xf32>
    %cst_122 = arith.constant dense<0.000000e+00> : vector<8x16xf32>
    %297 = tpu.matmul %296, %279, %cst_122 {dimension_numbers = #tpu.dot_dimension_numbers<[1], [0], [0], [1], [0, 0, 1, 1], [], []>} : vector<8x8xf32>, vector<8x16xf32>, vector<8x16xf32> -> vector<8x16xf32>
    %298 = arith.truncf %297 : vector<8x16xf32> to vector<8x16xbf16>
    %299 = vector.extract_strided_slice %227 {offsets = [32, 0], sizes = [16, 64], strides = [1, 1]} : vector<64x64xbf16> to vector<16x64xbf16>
    %cst_123 = arith.constant dense<0.000000e+00> : vector<8x64xf32>
    %300 = tpu.matmul %298, %299, %cst_123 {dimension_numbers = #tpu.dot_dimension_numbers<[1], [0], [0], [1], [0, 0, 1, 1], [], []>} : vector<8x16xbf16>, vector<16x64xbf16>, vector<8x64xf32> -> vector<8x64xf32>
    %301 = arith.addf %276, %300 : vector<8x64xf32>
    %302 = vector.extract_strided_slice %225 {offsets = [0, 48], sizes = [8, 16], strides = [1, 1]} : vector<8x192xf32> to vector<8x16xf32>
    %303 = vector.extract_strided_slice %225 {offsets = [0, 112], sizes = [8, 16], strides = [1, 1]} : vector<8x192xf32> to vector<8x16xf32>
    %304 = vector.extract_strided_slice %225 {offsets = [0, 176], sizes = [8, 16], strides = [1, 1]} : vector<8x192xf32> to vector<8x16xf32>
    "tpu.trace_start"() <{level = 10 : i32, message = "qd,kd->qk"}> : () -> ()
    %cst_124 = arith.constant dense<0.000000e+00> : vector<8x8xf32>
    %305 = tpu.matmul %302, %303, %cst_124 {dimension_numbers = #tpu.dot_dimension_numbers<[1], [1], [0], [0], [0, 0, 1, 0], [], []>} : vector<8x16xf32>, vector<8x16xf32>, vector<8x8xf32> -> vector<8x8xf32>
    %cst_125 = arith.constant 5.000000e-01 : f32
    "tpu.trace_stop"() : () -> ()
    %306 = vector.broadcast %cst_125 : f32 to vector<1x8xf32>
    %307 = arith.cmpf ogt, %1, %306 : vector<1x8xf32>
    %cst_126 = arith.constant -3.40282347E+38 : f32
    %308 = vector.shape_cast %307 : vector<1x8xi1> to vector<1x8xi1>
    %309 = vector.broadcast %308 : vector<1x8xi1> to vector<8x8xi1>
    %310 = vector.broadcast %cst_126 : f32 to vector<8x8xf32>
    %311 = arith.select %309, %305, %310 : vector<8x8xi1>, vector<8x8xf32>
    %cst_127 = arith.constant dense<0xFF800000> : vector<8xf32>
    %312 = vector.multi_reduction <maximumf>, %311, %cst_127 [1] : vector<8x8xf32> to vector<8xf32>
    %313 = vector.shape_cast %312 : vector<8xf32> to vector<8x1xf32>
    %314 = vector.broadcast %313 : vector<8x1xf32> to vector<8x8xf32>
    %315 = arith.subf %311, %314 : vector<8x8xf32>
    %316 = math.exp %315 : vector<8x8xf32>
    %cst_128 = arith.constant dense<0.000000e+00> : vector<8xf32>
    %317 = vector.multi_reduction <add>, %316, %cst_128 [1] : vector<8x8xf32> to vector<8xf32>
    %318 = vector.shape_cast %317 : vector<8xf32> to vector<8x1xf32>
    %319 = tpu.reciprocal %318 {approx = true} : vector<8x1xf32> -> vector<8x1xf32>
    %320 = vector.broadcast %319 : vector<8x1xf32> to vector<8x8xf32>
    %321 = arith.mulf %316, %320 : vector<8x8xf32>
    %cst_129 = arith.constant dense<0.000000e+00> : vector<8x16xf32>
    %322 = tpu.matmul %321, %304, %cst_129 {dimension_numbers = #tpu.dot_dimension_numbers<[1], [0], [0], [1], [0, 0, 1, 1], [], []>} : vector<8x8xf32>, vector<8x16xf32>, vector<8x16xf32> -> vector<8x16xf32>
    %323 = arith.truncf %322 : vector<8x16xf32> to vector<8x16xbf16>
    %324 = vector.extract_strided_slice %227 {offsets = [48, 0], sizes = [16, 64], strides = [1, 1]} : vector<64x64xbf16> to vector<16x64xbf16>
    %cst_130 = arith.constant dense<0.000000e+00> : vector<8x64xf32>
    %325 = tpu.matmul %323, %324, %cst_130 {dimension_numbers = #tpu.dot_dimension_numbers<[1], [0], [0], [1], [0, 0, 1, 1], [], []>} : vector<8x16xbf16>, vector<16x64xbf16>, vector<8x64xf32> -> vector<8x64xf32>
    %326 = arith.addf %301, %325 : vector<8x64xf32>
    %c1_131 = arith.constant 1 : index
    %c0_132 = arith.constant 0 : index
    %c0_133 = arith.constant 0 : index
    %327 = vector.load %arg8[%c1_131, %c0_132, %c0_133] : memref<2x1x64xf32, #tpu.memory_space<vmem>>, vector<1x1x64xf32>
    %328 = vector.shape_cast %327 : vector<1x1x64xf32> to vector<1x64xf32>
    %329 = vector.broadcast %328 : vector<1x64xf32> to vector<8x64xf32>
    %330 = arith.addf %326, %329 : vector<8x64xf32>
    %331 = arith.addf %330, %217 : vector<8x64xf32>
    %c1_134 = arith.constant 1 : index
    %c0_135 = arith.constant 0 : index
    %c0_136 = arith.constant 0 : index
    %332 = vector.load %arg9[%c1_134, %c0_135, %c0_136] : memref<2x1x64xf32, #tpu.memory_space<vmem>>, vector<1x1x64xf32>
    %333 = vector.shape_cast %332 : vector<1x1x64xf32> to vector<1x64xf32>
    %c1_137 = arith.constant 1 : index
    %c0_138 = arith.constant 0 : index
    %c0_139 = arith.constant 0 : index
    %334 = vector.load %arg10[%c1_137, %c0_138, %c0_139] : memref<2x1x64xf32, #tpu.memory_space<vmem>>, vector<1x1x64xf32>
    %335 = vector.shape_cast %334 : vector<1x1x64xf32> to vector<1x64xf32>
    %cst_140 = arith.constant dense<0.000000e+00> : vector<8xf32>
    %336 = vector.multi_reduction <add>, %331, %cst_140 [1] : vector<8x64xf32> to vector<8xf32>
    %337 = vector.shape_cast %336 : vector<8xf32> to vector<8x1xf32>
    %cst_141 = arith.constant 6.400000e+01 : f32
    %338 = vector.broadcast %cst_141 : f32 to vector<8x1xf32>
    %339 = arith.divf %337, %338 : vector<8x1xf32>
    %340 = vector.broadcast %339 : vector<8x1xf32> to vector<8x64xf32>
    %341 = arith.subf %331, %340 : vector<8x64xf32>
    %342 = arith.mulf %341, %341 : vector<8x64xf32>
    %cst_142 = arith.constant dense<0.000000e+00> : vector<8xf32>
    %343 = vector.multi_reduction <add>, %342, %cst_142 [1] : vector<8x64xf32> to vector<8xf32>
    %344 = vector.shape_cast %343 : vector<8xf32> to vector<8x1xf32>
    %cst_143 = arith.constant 6.400000e+01 : f32
    %345 = vector.broadcast %cst_143 : f32 to vector<8x1xf32>
    %346 = arith.divf %344, %345 : vector<8x1xf32>
    %cst_144 = arith.constant 9.99999996E-13 : f32
    %347 = vector.broadcast %cst_144 : f32 to vector<8x1xf32>
    %348 = arith.addf %346, %347 : vector<8x1xf32>
    %349 = math.rsqrt %348 : vector<8x1xf32>
    %350 = vector.broadcast %349 : vector<8x1xf32> to vector<8x64xf32>
    %351 = arith.mulf %341, %350 : vector<8x64xf32>
    %352 = vector.broadcast %333 : vector<1x64xf32> to vector<8x64xf32>
    %353 = arith.mulf %351, %352 : vector<8x64xf32>
    %354 = vector.broadcast %335 : vector<1x64xf32> to vector<8x64xf32>
    %355 = arith.addf %353, %354 : vector<8x64xf32>
    %356 = arith.truncf %355 : vector<8x64xf32> to vector<8x64xbf16>
    %c1_145 = arith.constant 1 : index
    %c0_146 = arith.constant 0 : index
    %c0_147 = arith.constant 0 : index
    %357 = vector.load %arg11[%c1_145, %c0_146, %c0_147] : memref<2x64x128xbf16, #tpu.memory_space<vmem>>, vector<1x64x128xbf16>
    %358 = vector.shape_cast %357 : vector<1x64x128xbf16> to vector<64x128xbf16>
    %cst_148 = arith.constant dense<0.000000e+00> : vector<8x128xf32>
    %359 = tpu.matmul %356, %358, %cst_148 {dimension_numbers = #tpu.dot_dimension_numbers<[1], [0], [0], [1], [0, 0, 1, 1], [], []>} : vector<8x64xbf16>, vector<64x128xbf16>, vector<8x128xf32> -> vector<8x128xf32>
    %c1_149 = arith.constant 1 : index
    %c0_150 = arith.constant 0 : index
    %c0_151 = arith.constant 0 : index
    %360 = vector.load %arg12[%c1_149, %c0_150, %c0_151] : memref<2x1x128xf32, #tpu.memory_space<vmem>>, vector<1x1x128xf32>
    %361 = vector.shape_cast %360 : vector<1x1x128xf32> to vector<1x128xf32>
    %362 = vector.broadcast %361 : vector<1x128xf32> to vector<8x128xf32>
    %363 = arith.addf %359, %362 : vector<8x128xf32>
    %364 = arith.mulf %363, %363 : vector<8x128xf32>
    %365 = arith.mulf %363, %364 : vector<8x128xf32>
    %cst_152 = arith.constant 4.471500e-02 : f32
    %366 = vector.broadcast %cst_152 : f32 to vector<8x128xf32>
    %367 = arith.mulf %366, %365 : vector<8x128xf32>
    %368 = arith.addf %363, %367 : vector<8x128xf32>
    %cst_153 = arith.constant 0.797884583 : f32
    %369 = vector.broadcast %cst_153 : f32 to vector<8x128xf32>
    %370 = arith.mulf %369, %368 : vector<8x128xf32>
    %371 = math.tanh %370 : vector<8x128xf32>
    %cst_154 = arith.constant 1.000000e+00 : f32
    %372 = vector.broadcast %cst_154 : f32 to vector<8x128xf32>
    %373 = arith.addf %372, %371 : vector<8x128xf32>
    %cst_155 = arith.constant 5.000000e-01 : f32
    %374 = vector.broadcast %cst_155 : f32 to vector<8x128xf32>
    %375 = arith.mulf %374, %373 : vector<8x128xf32>
    %376 = arith.mulf %363, %375 : vector<8x128xf32>
    %377 = arith.truncf %376 : vector<8x128xf32> to vector<8x128xbf16>
    %c1_156 = arith.constant 1 : index
    %c0_157 = arith.constant 0 : index
    %c0_158 = arith.constant 0 : index
    %378 = vector.load %arg13[%c1_156, %c0_157, %c0_158] : memref<2x128x64xbf16, #tpu.memory_space<vmem>>, vector<1x128x64xbf16>
    %379 = vector.shape_cast %378 : vector<1x128x64xbf16> to vector<128x64xbf16>
    %cst_159 = arith.constant dense<0.000000e+00> : vector<8x64xf32>
    %380 = tpu.matmul %377, %379, %cst_159 {dimension_numbers = #tpu.dot_dimension_numbers<[1], [0], [0], [1], [0, 0, 1, 1], [], []>} : vector<8x128xbf16>, vector<128x64xbf16>, vector<8x64xf32> -> vector<8x64xf32>
    %c1_160 = arith.constant 1 : index
    %c0_161 = arith.constant 0 : index
    %c0_162 = arith.constant 0 : index
    %381 = vector.load %arg14[%c1_160, %c0_161, %c0_162] : memref<2x1x64xf32, #tpu.memory_space<vmem>>, vector<1x1x64xf32>
    %382 = vector.shape_cast %381 : vector<1x1x64xf32> to vector<1x64xf32>
    %383 = vector.broadcast %382 : vector<1x64xf32> to vector<8x64xf32>
    %384 = arith.addf %380, %383 : vector<8x64xf32>
    %385 = arith.addf %384, %355 : vector<8x64xf32>
    %c1_163 = arith.constant 1 : index
    %c0_164 = arith.constant 0 : index
    %c0_165 = arith.constant 0 : index
    %386 = vector.load %arg15[%c1_163, %c0_164, %c0_165] : memref<2x1x64xf32, #tpu.memory_space<vmem>>, vector<1x1x64xf32>
    %387 = vector.shape_cast %386 : vector<1x1x64xf32> to vector<1x64xf32>
    %c1_166 = arith.constant 1 : index
    %c0_167 = arith.constant 0 : index
    %c0_168 = arith.constant 0 : index
    %388 = vector.load %arg16[%c1_166, %c0_167, %c0_168] : memref<2x1x64xf32, #tpu.memory_space<vmem>>, vector<1x1x64xf32>
    %389 = vector.shape_cast %388 : vector<1x1x64xf32> to vector<1x64xf32>
    %cst_169 = arith.constant dense<0.000000e+00> : vector<8xf32>
    %390 = vector.multi_reduction <add>, %385, %cst_169 [1] : vector<8x64xf32> to vector<8xf32>
    %391 = vector.shape_cast %390 : vector<8xf32> to vector<8x1xf32>
    %cst_170 = arith.constant 6.400000e+01 : f32
    %392 = vector.broadcast %cst_170 : f32 to vector<8x1xf32>
    %393 = arith.divf %391, %392 : vector<8x1xf32>
    %394 = vector.broadcast %393 : vector<8x1xf32> to vector<8x64xf32>
    %395 = arith.subf %385, %394 : vector<8x64xf32>
    %396 = arith.mulf %395, %395 : vector<8x64xf32>
    %cst_171 = arith.constant dense<0.000000e+00> : vector<8xf32>
    %397 = vector.multi_reduction <add>, %396, %cst_171 [1] : vector<8x64xf32> to vector<8xf32>
    %398 = vector.shape_cast %397 : vector<8xf32> to vector<8x1xf32>
    %cst_172 = arith.constant 6.400000e+01 : f32
    %399 = vector.broadcast %cst_172 : f32 to vector<8x1xf32>
    %400 = arith.divf %398, %399 : vector<8x1xf32>
    %cst_173 = arith.constant 9.99999996E-13 : f32
    %401 = vector.broadcast %cst_173 : f32 to vector<8x1xf32>
    %402 = arith.addf %400, %401 : vector<8x1xf32>
    %403 = math.rsqrt %402 : vector<8x1xf32>
    %404 = vector.broadcast %403 : vector<8x1xf32> to vector<8x64xf32>
    %405 = arith.mulf %395, %404 : vector<8x64xf32>
    %406 = vector.broadcast %387 : vector<1x64xf32> to vector<8x64xf32>
    %407 = arith.mulf %405, %406 : vector<8x64xf32>
    %408 = vector.broadcast %389 : vector<1x64xf32> to vector<8x64xf32>
    %409 = arith.addf %407, %408 : vector<8x64xf32>
    %cst_174 = arith.constant dense<0.000000e+00> : vector<64xf32>
    %410 = vector.multi_reduction <add>, %409, %cst_174 [0] : vector<8x64xf32> to vector<64xf32>
    %411 = vector.shape_cast %410 : vector<64xf32> to vector<1x64xf32>
    %cst_175 = arith.constant 8.000000e+00 : f32
    %412 = vector.broadcast %cst_175 : f32 to vector<1x64xf32>
    %413 = arith.divf %411, %412 : vector<1x64xf32>
    %c0_176 = arith.constant 0 : index
    %c0_177 = arith.constant 0 : index
    %414 = vector.load %arg17[%c0_176, %c0_177] : memref<64x32xf32, #tpu.memory_space<vmem>>, vector<64x32xf32>
    %cst_178 = arith.constant dense<0.000000e+00> : vector<1x32xf32>
    %415 = tpu.matmul %413, %414, %cst_178 {dimension_numbers = #tpu.dot_dimension_numbers<[1], [0], [0], [1], [0, 0, 1, 1], [], []>} : vector<1x64xf32>, vector<64x32xf32>, vector<1x32xf32> -> vector<1x32xf32>
    %c0_179 = arith.constant 0 : index
    %c0_180 = arith.constant 0 : index
    %416 = vector.load %arg18[%c0_179, %c0_180] : memref<1x32xf32, #tpu.memory_space<vmem>>, vector<1x32xf32>
    %417 = arith.addf %415, %416 : vector<1x32xf32>
    %cst_181 = arith.constant 0.000000e+00 : f32
    %418 = vector.broadcast %cst_181 : f32 to vector<1x32xf32>
    %419 = arith.maximumf %417, %418 : vector<1x32xf32>
    %c0_182 = arith.constant 0 : index
    %c0_183 = arith.constant 0 : index
    %420 = vector.load %arg19[%c0_182, %c0_183] : memref<1x32xf32, #tpu.memory_space<vmem>>, vector<1x32xf32>
    %421 = arith.mulf %419, %420 : vector<1x32xf32>
    %cst_184 = arith.constant dense<0.000000e+00> : vector<1xf32>
    %422 = vector.multi_reduction <add>, %421, %cst_184 [1] : vector<1x32xf32> to vector<1xf32>
    %423 = vector.shape_cast %422 : vector<1xf32> to vector<1x1xf32>
    %c0_185 = arith.constant 0 : index
    %c0_186 = arith.constant 0 : index
    %424 = vector.load %arg20[%c0_185, %c0_186] : memref<1x1xf32, #tpu.memory_space<vmem>>, vector<1x1xf32>
    %425 = arith.addf %423, %424 : vector<1x1xf32>
    %426 = arith.negf %425 : vector<1x1xf32>
    %427 = math.exp %426 : vector<1x1xf32>
    %cst_187 = arith.constant 1.000000e+00 : f32
    %428 = vector.broadcast %cst_187 : f32 to vector<1x1xf32>
    %429 = arith.addf %428, %427 : vector<1x1xf32>
    %430 = arith.divf %428, %429 : vector<1x1xf32>
    %c0_188 = arith.constant 0 : index
    %c0_189 = arith.constant 0 : index
    %c0_190 = arith.constant 0 : index
    %431 = vector.load %arg21[%c0_188, %c0_189, %c0_190] : memref<1x1x1xf32, #tpu.memory_space<vmem>>, vector<1x1x1xf32>
    %432 = vector.shape_cast %431 : vector<1x1x1xf32> to vector<1x1xf32>
    %433 = vector.shape_cast %430 : vector<1x1xf32> to vector<1x1x1xf32>
    tpu.vector_store %arg21[%c0_188, %c0_189, %c0_190], %433 {strides = array<i32>} : memref<1x1x1xf32, #tpu.memory_space<vmem>>, vector<1x1x1xf32>,
    return
  }
  func.func @transform_0(%arg0: i32) -> (i32, i32, i32) {
    %c0_i32 = arith.constant 0 : i32
    %c0_i32_0 = arith.constant 0 : i32
    %c0_i32_1 = arith.constant 0 : i32
    return %arg0, %c0_i32, %c0_i32_0 : i32, i32, i32
  }
  func.func @transform_1(%arg0: i32) -> (i32, i32, i32) {
    %c0_i32 = arith.constant 0 : i32
    %c0_i32_0 = arith.constant 0 : i32
    %c0_i32_1 = arith.constant 0 : i32
    return %arg0, %c0_i32, %c0_i32_0 : i32, i32, i32
  }
  func.func @transform_2(%arg0: i32) -> (i32, i32) {
    %c0_i32 = arith.constant 0 : i32
    %c0_i32_0 = arith.constant 0 : i32
    %c0_i32_1 = arith.constant 0 : i32
    return %c0_i32, %c0_i32_0 : i32, i32
  }
  func.func @transform_3(%arg0: i32) -> (i32, i32) {
    %c0_i32 = arith.constant 0 : i32
    %c0_i32_0 = arith.constant 0 : i32
    %c0_i32_1 = arith.constant 0 : i32
    return %c0_i32, %c0_i32_0 : i32, i32
  }
  func.func @transform_4(%arg0: i32) -> (i32, i32, i32) {
    %c0_i32 = arith.constant 0 : i32
    %c0_i32_0 = arith.constant 0 : i32
    %c0_i32_1 = arith.constant 0 : i32
    %c0_i32_2 = arith.constant 0 : i32
    return %c0_i32, %c0_i32_0, %c0_i32_1 : i32, i32, i32
  }
  func.func @transform_5(%arg0: i32) -> (i32, i32, i32) {
    %c0_i32 = arith.constant 0 : i32
    %c0_i32_0 = arith.constant 0 : i32
    %c0_i32_1 = arith.constant 0 : i32
    %c0_i32_2 = arith.constant 0 : i32
    return %c0_i32, %c0_i32_0, %c0_i32_1 : i32, i32, i32
  }
  func.func @transform_6(%arg0: i32) -> (i32, i32, i32) {
    %c0_i32 = arith.constant 0 : i32
    %c0_i32_0 = arith.constant 0 : i32
    %c0_i32_1 = arith.constant 0 : i32
    %c0_i32_2 = arith.constant 0 : i32
    return %c0_i32, %c0_i32_0, %c0_i32_1 : i32, i32, i32
  }
  func.func @transform_7(%arg0: i32) -> (i32, i32, i32) {
    %c0_i32 = arith.constant 0 : i32
    %c0_i32_0 = arith.constant 0 : i32
    %c0_i32_1 = arith.constant 0 : i32
    %c0_i32_2 = arith.constant 0 : i32
    return %c0_i32, %c0_i32_0, %c0_i32_1 : i32, i32, i32
  }
  func.func @transform_8(%arg0: i32) -> (i32, i32, i32) {
    %c0_i32 = arith.constant 0 : i32
    %c0_i32_0 = arith.constant 0 : i32
    %c0_i32_1 = arith.constant 0 : i32
    %c0_i32_2 = arith.constant 0 : i32
    return %c0_i32, %c0_i32_0, %c0_i32_1 : i32, i32, i32
  }
  func.func @transform_9(%arg0: i32) -> (i32, i32, i32) {
    %c0_i32 = arith.constant 0 : i32
    %c0_i32_0 = arith.constant 0 : i32
    %c0_i32_1 = arith.constant 0 : i32
    %c0_i32_2 = arith.constant 0 : i32
    return %c0_i32, %c0_i32_0, %c0_i32_1 : i32, i32, i32
  }
  func.func @transform_10(%arg0: i32) -> (i32, i32, i32) {
    %c0_i32 = arith.constant 0 : i32
    %c0_i32_0 = arith.constant 0 : i32
    %c0_i32_1 = arith.constant 0 : i32
    %c0_i32_2 = arith.constant 0 : i32
    return %c0_i32, %c0_i32_0, %c0_i32_1 : i32, i32, i32
  }
  func.func @transform_11(%arg0: i32) -> (i32, i32, i32) {
    %c0_i32 = arith.constant 0 : i32
    %c0_i32_0 = arith.constant 0 : i32
    %c0_i32_1 = arith.constant 0 : i32
    %c0_i32_2 = arith.constant 0 : i32
    return %c0_i32, %c0_i32_0, %c0_i32_1 : i32, i32, i32
  }
  func.func @transform_12(%arg0: i32) -> (i32, i32, i32) {
    %c0_i32 = arith.constant 0 : i32
    %c0_i32_0 = arith.constant 0 : i32
    %c0_i32_1 = arith.constant 0 : i32
    %c0_i32_2 = arith.constant 0 : i32
    return %c0_i32, %c0_i32_0, %c0_i32_1 : i32, i32, i32
  }
  func.func @transform_13(%arg0: i32) -> (i32, i32, i32) {
    %c0_i32 = arith.constant 0 : i32
    %c0_i32_0 = arith.constant 0 : i32
    %c0_i32_1 = arith.constant 0 : i32
    %c0_i32_2 = arith.constant 0 : i32
    return %c0_i32, %c0_i32_0, %c0_i32_1 : i32, i32, i32
  }
  func.func @transform_14(%arg0: i32) -> (i32, i32, i32) {
    %c0_i32 = arith.constant 0 : i32
    %c0_i32_0 = arith.constant 0 : i32
    %c0_i32_1 = arith.constant 0 : i32
    %c0_i32_2 = arith.constant 0 : i32
    return %c0_i32, %c0_i32_0, %c0_i32_1 : i32, i32, i32
  }
  func.func @transform_15(%arg0: i32) -> (i32, i32, i32) {
    %c0_i32 = arith.constant 0 : i32
    %c0_i32_0 = arith.constant 0 : i32
    %c0_i32_1 = arith.constant 0 : i32
    %c0_i32_2 = arith.constant 0 : i32
    return %c0_i32, %c0_i32_0, %c0_i32_1 : i32, i32, i32
  }
  func.func @transform_16(%arg0: i32) -> (i32, i32) {
    %c0_i32 = arith.constant 0 : i32
    %c0_i32_0 = arith.constant 0 : i32
    %c0_i32_1 = arith.constant 0 : i32
    return %c0_i32, %c0_i32_0 : i32, i32
  }
  func.func @transform_17(%arg0: i32) -> (i32, i32) {
    %c0_i32 = arith.constant 0 : i32
    %c0_i32_0 = arith.constant 0 : i32
    %c0_i32_1 = arith.constant 0 : i32
    return %c0_i32, %c0_i32_0 : i32, i32
  }
  func.func @transform_18(%arg0: i32) -> (i32, i32) {
    %c0_i32 = arith.constant 0 : i32
    %c0_i32_0 = arith.constant 0 : i32
    %c0_i32_1 = arith.constant 0 : i32
    return %c0_i32, %c0_i32_0 : i32, i32
  }
  func.func @transform_19(%arg0: i32) -> (i32, i32) {
    %c0_i32 = arith.constant 0 : i32
    %c0_i32_0 = arith.constant 0 : i32
    %c0_i32_1 = arith.constant 0 : i32
    return %c0_i32, %c0_i32_0 : i32, i32
  }
  func.func @transform_20(%arg0: i32) -> (i32, i32, i32) {
    %c0_i32 = arith.constant 0 : i32
    %c0_i32_0 = arith.constant 0 : i32
    %c0_i32_1 = arith.constant 0 : i32
    return %arg0, %c0_i32, %c0_i32_0 : i32, i32, i32
  }
}

</mosaic_0001>

<bundles_post_ra>
// kernel: forward.1
= control target key start
LH: loop header
LB: loop body
LE: loop exit
PB: predicated region body
PF: predicated region fallthrough
CT: control target
= control target key end

     0   :  { %s2707_s23 = smov 0   ;;  %s3158_s0 = inlined_call_operand.vmem [shape: f32[2,8,64], index: 0, kind: input, shape index: {}]   ;;  %s3159_s1 = inlined_call_operand.vmem [shape: f32[2,1,8], index: 1, kind: input, shape index: {}]   ;;  %s3160_s2 = inlined_call_operand.vmem [shape: f32[1,64], index: 2, kind: input, shape index: {}]   ;;  %s3161_s3 = inlined_call_operand.vmem [shape: f32[1,64], index: 3, kind: input, shape index: {}]   ;;  %s3162_s4 = inlined_call_operand.vmem [shape: bf16[2,64,192], index: 4, kind: input, shape index: {}]   ;;  %s3163_s5 = inlined_call_operand.vmem [shape: f32[2,1,192], index: 5, kind: input, shape index: {}]   ;;  %s3164_s6 = inlined_call_operand.vmem [shape: bf16[2,64,64], index: 6, kind: input, shape index: {}]   ;;  %s3165_s7 = inlined_call_operand.vmem [shape: f32[2,1,64], index: 7, kind: input, shape index: {}]   ;;  %s3166_s8 = inlined_call_operand.vmem [shape: f32[2,1,64], index: 8, kind: input, shape index: {}]   ;;  %s3167_s9 = inlined_call_operand.vmem [shape: f32[2,1,64], index: 9, kind: input, shape index: {}]   ;;  %s3168_s10 = inlined_call_operand.vmem [shape: bf16[2,64,128], index: 10, kind: input, shape index: {}]   ;;  %s3169_s11 = inlined_call_operand.vmem [shape: f32[2,1,128], index: 11, kind: input, shape index: {}]   ;;  %s3170_s12 = inlined_call_operand.vmem [shape: bf16[2,128,64], index: 12, kind: input, shape index: {}]   ;;  %s3171_s13 = inlined_call_operand.vmem [shape: f32[2,1,64], index: 13, kind: input, shape index: {}]   ;;  %s3172_s14 = inlined_call_operand.vmem [shape: f32[2,1,64], index: 14, kind: input, shape index: {}]   ;;  %s3173_s15 = inlined_call_operand.vmem [shape: f32[2,1,64], index: 15, kind: input, shape index: {}]   ;;  %s3174_s16 = inlined_call_operand.vmem [shape: f32[64,32], index: 16, kind: input, shape index: {}]   ;;  %s3175_s17 = inlined_call_operand.vmem [shape: f32[1,32], index: 17, kind: input, shape index: {}]   ;;  %s3176_s18 = inlined_call_operand.vmem [shape: f32[1,32], index: 18, kind: input, shape index: {}]   ;;  %s3177_s19 = inlined_call_operand.<no memory space> [shape: f32[1,1], index: 19, kind: input, shape index: {}]   ;;  %s3178_s20 = inlined_call_operand.vmem [shape: f32[2,1,1], index: 20, kind: output, shape index: {}]  }
   0x1   :  { %3186 = sst [smem:[#allocation3_spill]] %s3158_s0  ;;  %v25_v0 = vstv %s3177_s19 }
   0x2   :  { %3187 = sst [smem:[#allocation4_spill]] %s3159_s1  ;;  %26 = vst [vmem:[#allocation2] sm:$0x1] %v25_v0 }
   0x3   :  { %3188 = sst [smem:[#allocation5_spill]] %s3160_s2 }
   0x4   :  { %3189 = sst [smem:[#allocation6_spill]] %s3161_s3 }
   0x5   :  { %3190 = sst [smem:[#allocation7_spill]] %s3162_s4 }
   0x6 LB: > { %s2157_s24 = sadd.s32 4294967295, %s2587_s23   ;;  %p2161_p0 = scmp.ge.s32.totalorder %s2587_s23, 1  ;;  %s2587_s23 = sphi %s2707_s23, %s32_s23  }
   0x7   : > { %p571_p1 = scmp.lt.s32.totalorder %s2587_s23, 3 }
   0x9   : > { %p572_p2 = pnand %p2161_p0, %p571_p1 }
   0xa   : > { %p629_p3 = scmp.lt.s32.totalorder (!%p572_p2), %s2157_s24, 1  ;;  %s3191_s3 = sld [smem:[#allocation3_spill]] (!%p572_p2) }
   0xb   : > { %575 = sbr.rel (%p572_p2) target bundleno = 5271 (0x1497), region = 100  ;;  %s3192_s4 = sld [smem:[#allocation7_spill]] (!%p572_p2) }
   0xc   : > { %s3184_s28 = smov (!%p572_p2), 96   ;;  %s2591_s29 = smov (!%p572_p2), 64  }
   0xd   : > { %s3183_s30 = smov (!%p572_p2), 32   ;;  %s3195_s1 = sld [smem:[#allocation4_spill]] (!%p572_p2) }
   0xe   : > { %s2595_s2 = smov (!%p572_p2), 112   ;;  %s3181_s25 = smov (!%p572_p2), 80  }
  0x10   : > { %s3203_s24 = smov (!%p629_p3, %s2157_s24), 1  ;;  %vm644_vm0 = vcmask 523264   ;;  %v2589_v3 = vmov 64.0   ;;  %v691_v55 = vld [vmem:[%s3163_s5] sm:$0x3]  ;;  %vm777_vm5 = vcmask 130048  }
  0x11   : > { %s2162_s19 = sshll.u32 %s3203_s24, 3  ;;  %2527 = vrcp.f32 %v2589_v3  ;;  %v2189_v15 = vld [vmem:[%s3192_s4 + $0x30] sm:$0xf]  ;;  %v2452_v16 = vld [vmem:[%s3192_s4 + $0x34] sm:$0xf0]  ;;  %v693_v56 = vperm.slane %v691_v55, 0 }
  0x12   : > { %s632_s26 = scalar_lea.vmem %s3191_s3, %s2162_s19  ;;  %v2451_v17 = vld [vmem:[%s3192_s4 + $0x34] sm:$0xf]  ;;  %v2190_v18 = vor.u32 %v2452_v16, %v2189_v15  ;;  %v2191_v19 = vld [vmem:[%s3192_s4 + $0x38] sm:$0xf0]  ;;  %v2181_v21 = vld [vmem:[%s3192_s4 + $0x20] sm:$0xf] }
  0x13   : > { %v641_v1 = vld [vmem:[%s632_s26] sm:$0xff]  ;;  %v2194_v20 = vor.u32 %v2451_v17, %v2191_v19  ;;  %v2450_v22 = vld [vmem:[%s3192_s4 + $0x24] sm:$0xf0]  ;;  %v2183_v25 = vld [vmem:[%s3192_s4 + $0x28] sm:$0xf0]  ;;  %s3193_s19 = sld [smem:[#allocation5_spill]]  ;;  %s635_s22 = scalar_lea.vmem %s3195_s1, %s3203_s24 }
  0x14   : > { %v645_v2 = vsel %vm644_vm0, %v641_v1, 0.0  ;;  %744 = vmatpush.bf16.msra.mxu0 %v2190_v18  ;;  %v2449_v23 = vld [vmem:[%s3192_s4 + $0x24] sm:$0xf]  ;;  %v2182_v24 = vor.u32 %v2450_v22, %v2181_v21  ;;  %v2173_v27 = vld [vmem:[%s3192_s4 + $0x10] sm:$0xf]  ;;  %s3194_s3 = sld [smem:[#allocation6_spill]]  ;;  %s638_s1 = scalar_lea.vmem %s3178_s20, %s3203_s24 }
  0x15   : > { %646 = vadd.xlane.f32.xlu0 %v645_v2  ;;  %757 = vmatpush.bf16.msra.mxu1 %v2194_v20  ;;  %v2186_v26 = vor.u32 %v2449_v23, %v2183_v25  ;;  %v2448_v28 = vld [vmem:[%s3192_s4 + $0x14] sm:$0xf0]  ;;  %v2447_v29 = vld [vmem:[%s3192_s4 + $0x14] sm:$0xf]  ;;  %v2175_v31 = vld [vmem:[%s3192_s4 + $0x18] sm:$0xf0] }
  0x16   : > { %v2174_v30 = vor.u32 %v2448_v28, %v2173_v27  ;;  %v2178_v32 = vor.u32 %v2447_v29, %v2175_v31  ;;  %v2165_v33 = vld [vmem:[%s3192_s4] sm:$0xf]  ;;  %v2446_v34 = vld [vmem:[%s3192_s4 + $0x4] sm:$0xf0]  ;;  %v2445_v35 = vld [vmem:[%s3192_s4 + $0x4] sm:$0xf] }
  0x17   : > { %v2528_v4 = vpop.eup %2527  ;;  %v2166_v36 = vor.u32 %v2446_v34, %v2165_v33  ;;  %v2167_v37 = vld [vmem:[%s3192_s4 + $0x8] sm:$0xf0]  ;;  %v694_v57 = vperm.slane %v691_v55, 1  ;;  %v640_v3 = vld [vmem:[%s635_s22] sm:$0x1]  ;;  %vm807_vm8 = vcmask 64512  }
  0x18   : > { %v649_v5 = vmul.f32 64.0, %v2528_v4  ;;  %vm653_vm1 = vweird.f32 %v2528_v4  ;;  %745 = vmatpush.bf16.msra.mxu0 %v2182_v24  ;;  %v2170_v38 = vor.u32 %v2445_v35, %v2167_v37  ;;  %vm802_vm6 = vcmp.gt.f32.partialorder %v640_v3, 0.5  ;;  %v2455_v3 = vld [vmem:[%s3164_s6 + $0x10] sm:$0xff] }
  0x19   : > { %758 = vmatpush.bf16.msra.mxu1 %v2186_v26  ;;  %v2511_v48 = vld [vmem:[%s3193_s19] ss:$0 sm:$0xff]  ;;  %s2594_s19 = smov 48  }
  0x1a   : > { %v650_v6 = vsub.f32 1.0, %v649_v5  ;;  %v2512_v51 = vld [vmem:[%s3194_s3] ss:$0 sm:$0xff]  ;;  %s3180_s3 = smov 16  }
  0x1c   : > { %v651_v7 = vmul.f32 %v2528_v4, %v650_v6  ;;  %746 = vmatpush.bf16.msra.mxu0 %v2174_v30 }
  0x1d   : > { %759 = vmatpush.bf16.msra.mxu1 %v2178_v32 }
  0x1e   : > { %v652_v8 = vadd.f32 %v2528_v4, %v651_v7 }
  0x20   : > { %v2722_v9 = vsel %vm653_vm1, %v2528_v4, %v652_v8  ;;  %747 = vmatpush.bf16.msra.mxu0 %v2166_v36  ;;  %v2593_v4 = vmov 0  }
  0x21   : > { %760 = vmatpush.bf16.msra.mxu1 %v2170_v38  ;;  %v803_v5 = vsel %vm802_vm6, 1, %v2593_v4 }
  0x22   : > { %v804_v6 = vperm.slane %v803_v5, 0 }
  0x24   : > { %vm2804_vm7 = vcmp.eq.s32.totalorder %v804_v6, 1 }
  0x88   : > { %v647_v10 = vpop.xlane.xlu0 %646 }
  0x89   : > { %v655_v11 = vmul.f32 %v2722_v9, %v647_v10 }
  0x8b   : > { %v656_v12 = vsub.f32 %v641_v1, %v655_v11 }
  0x8d   : > { %v657_v13 = vmul.f32 %v656_v12, %v656_v12 }
  0x8f   : > { %v658_v14 = vsel %vm644_vm0, %v657_v13, 0.0 }
  0x90   : > { %659 = vadd.xlane.f32.xlu0 %v658_v14 }
 0x103   : > { %v660_v39 = vpop.xlane.xlu0 %659 }
 0x104   : > { %v661_v40 = vmul.f32 %v660_v39, %v2722_v9 }
 0x106   : > { %v662_v41 = vadd.f32 1e-12, %v661_v40 }
 0x108   : > { %2529 = vrsqrt.f32 %v662_v41  ;;  %vm669_vm3 = vweird.f32 %v662_v41 }
 0x10e   : > { %v2530_v42 = vpop.eup %2529 }
 0x10f   : > { %v664_v43 = vmul.f32 %v2530_v42, %v662_v41  ;;  %vm670_vm2 = vweird.f32 %v2530_v42 }
 0x110   : > { %vm671_vm4 = vmor %vm669_vm3, %vm670_vm2 }
 0x111   : > { %v665_v44 = vmul.f32 %v2530_v42, %v664_v43 }
 0x113   : > { %v666_v45 = vmul.f32 0.5, %v665_v44 }
 0x115   : > { %v667_v46 = vsub.f32 1.5, %v666_v45 }
 0x117   : > { %v668_v47 = vmul.f32 %v2530_v42, %v667_v46 }
 0x119   : > { %v672_v49 = vsel %vm671_vm4, %v2530_v42, %v668_v47 }
 0x11a   : > { %v673_v50 = vmul.f32 %v672_v49, %v656_v12 }
 0x11c   : > { %v677_v52 = vmul.f32 %v2511_v48, %v673_v50 }
 0x11e   : > { %v2781_v53 = vadd.f32 %v2512_v51, %v677_v52 }
 0x120   : > { %v682_v54 = vpack.c.bf16 %v2781_v53, %v2781_v53 }
 0x122   : > { %2195 = vmatmul.msk.bf16.vlgmr.msra.gmra.mxu0 %vm644_vm0, %v682_v54  ;;  %2196 = vmatmul.msk.bf16.vlgmr.msra.gmra.mxu1 %vm644_vm0, %v682_v54 }
 0x19f   : > { %v749_v58 = vpop.f32.mrf.mxu0  ;;  %v762_v59 = vpop.f32.mrf.mxu1 }
 0x1a0   : > { %v750_v60 = vadd.f32 %v749_v58, %v693_v56  ;;  %v2790_v61 = vadd.f32 %v762_v59, %v694_v57  ;;  %v2453_v57 = vld [vmem:[%s3164_s6] sm:$0xff] }
 0x1a2   : > { %837 = vmatpush.msra.mxu3 %v2790_v61  ;;  %955 = vrot.lane.b32.xlu2 %v750_v60, %s3184_s28 }
 0x1a3   : > { %775 = vrot.lane.b32.xlu1 %v750_v60, %s2591_s29 }
 0x1a7   : > { %v751_v62 = vpop.f32.mrf.mxu0  ;;  %v764_v63 = vpop.f32.mrf.mxu1 }
 0x1ab   : > { %957 = vrot.lane.b32.xlu1 %v750_v60, %s3183_s30 }
 0x1fc   : > { %v956_v2 = vpop.permute.xlu2 %955 }
 0x215   : > { %v776_v0 = vpop.permute.xlu1 %775 }
 0x216   : > { %2197 = vmatpush.xpose.msk.msra.mxu2 %vm777_vm5, %v776_v0 }
 0x219   : > { %2198 = vmatmul.msk.f32.vlgmr.msra.gmra.mxu2 %vm777_vm5, %v750_v60 }
 0x21d   : > { %v958_v1 = vpop.permute.xlu1 %957 }
 0x21e   : > { %2213 = vmatpush.xpose.msk.msrb.mxu0 %vm777_vm5, %v958_v1  ;;  %v2456_v1 = vld [vmem:[%s3164_s6 + $0x18] sm:$0xff] }
 0x221   : > { %2214 = vmatmul.msk.f32.vlgmr.msrb.gmra.mxu0 %vm777_vm5, %v956_v2  ;;  %v2454_v2 = vld [vmem:[%s3164_s6 + $0x8] sm:$0xff] }
 0x29c   : > { %v799_v8 = vpop.f32.mrf.mxu2 }
 0x29d   : > { %v806_v10 = vsel %vm2804_vm7, %v799_v8, -3.4028235e+38 }
 0x29e   : > { %v980_v11 = vpop.f32.mrf.mxu0  ;;  %v808_v12 = vsel %vm807_vm8, %v806_v10, -inf }
 0x29f   : > { %v983_v13 = vsel %vm2804_vm7, %v980_v11, -3.4028235e+38  ;;  %809 = vmax.xlane.f32.xlu2 %v808_v12 }
 0x2a0   : > { %v984_v14 = vsel %vm807_vm8, %v983_v13, -inf }
 0x2a1   : > { %985 = vmax.xlane.f32.xlu0 %v984_v14 }
 0x2b5   : > { %845 = vrot.lane.b32.xlu0 %v750_v60, %s2594_s19 }
 0x2bd   : > { %843 = vrot.lane.b32.xlu0 %v750_v60, %s2595_s2 }
 0x2c5   : > { %995 = vrot.lane.b32.xlu0 %v2790_v61, %s3184_s28  ;;  %s3201_s28 = smov 16  }
 0x312   : > { %v810_v15 = vpop.xlane.xlu2 %809 }
 0x313   : > { %v811_v16 = vsub.f32 %v806_v10, %v810_v15 }
 0x314   : > { %v986_v17 = vpop.xlane.xlu0 %985 }
 0x315   : > { %v812_v18 = vmul.f32 1.442695, %v811_v16  ;;  %v987_v19 = vsub.f32 %v983_v13, %v986_v17 }
 0x317   : > { %2531 = vpow2.f32 %v812_v18  ;;  %v988_v20 = vmul.f32 1.442695, %v987_v19 }
 0x319   : > { %2533 = vpow2.f32 %v988_v20  ;;  %v2513_v20 = vld [vmem:[%s3165_s7] ss:$0 sm:$0xff] }
 0x31d   : > { %v2532_v21 = vpop.eup %2531 }
 0x31e   : > { %v814_v22 = vsel %vm807_vm8, %v2532_v21, 0.0 }
 0x31f   : > { %v2534_v23 = vpop.eup %2533  ;;  %815 = vadd.xlane.f32.xlu1 %v814_v22 }
 0x320   : > { %v990_v24 = vsel %vm807_vm8, %v2534_v23, 0.0 }
 0x321   : > { %991 = vadd.xlane.f32.xlu2 %v990_v24 }
 0x327   : > { %v846_v25 = vpop.permute.xlu0 %845 }
 0x328   : > { %2200 = vmatpush.xpose.msk.msrb.mxu3 %vm777_vm5, %v846_v25 }
 0x32f   : > { %v844_v26 = vpop.permute.xlu0 %843 }
 0x337   : > { %v996_v27 = vpop.permute.xlu0 %995 }
 0x338   : > { %1045 = vrot.lane.b32.xlu1 %v750_v60, %s3181_s25  ;;  %1016 = vmatpush.msrb.mxu1 %v996_v27 }
 0x339   : > { %1047 = vrot.lane.b32.xlu2 %v750_v60, %s3180_s3 }
 0x392   : > { %v816_v28 = vpop.xlane.xlu1 %815 }
 0x393   : > { %2535 = vrcp.f32 %v816_v28 }
 0x394   : > { %v992_v29 = vpop.xlane.xlu2 %991 }
 0x395   : > { %2537 = vrcp.f32 %v992_v29 }
 0x399   : > { %v2536_v30 = vpop.eup %2535 }
 0x39a   : > { %v818_v31 = vmul.f32 %v2536_v30, %v2532_v21 }
 0x39b   : > { %v2538_v32 = vpop.eup %2537 }
 0x39c   : > { %v1048_v33 = vpop.permute.xlu2 %1047  ;;  %2199 = vmatmul.msk.f32.vlgmr.msra.gmra.mxu3 %vm807_vm8, %v818_v31  ;;  %v994_v34 = vmul.f32 %v2538_v32, %v2534_v23  ;;  %v2460_v31 = vld [vmem:[%s3168_s10 + $0x18] sm:$0xff]  ;;  %v2458_v32 = vld [vmem:[%s3168_s10 + $0x8] sm:$0xff] }
 0x39d   : > { %2221 = vmatpush.xpose.msk.msra.mxu1 %vm777_vm5, %v1048_v33  ;;  %927 = vmatpush.bf16.msra.mxu3 %v2454_v2  ;;  %v2457_v33 = vld [vmem:[%s3168_s10] sm:$0xff] }
 0x39e   : > { %2215 = vmatmul.msk.f32.vlgmr.msrb.gmra.mxu1 %vm807_vm8, %v994_v34  ;;  %v2468_v34 = vld [vmem:[%s3170_s12 + $0x38] sm:$0xff] }
 0x3a1   : > { %1128 = vmatpush.bf16.msrb.mxu1 %v2456_v1 }
 0x3a4   : > { %2201 = vmatmul.msk.f32.vlgmr.msrb.gmra.mxu3 %vm777_vm5, %v844_v26 }
 0x3a5   : > { %1038 = vmatpush.bf16.msrb.mxu3 %v2455_v3 }
 0x3aa   : > { %v1046_v35 = vpop.permute.xlu1 %1045 }
 0x3ab   : > { %2222 = vmatmul.msk.f32.vlgmr.msra.gmra.mxu1 %vm777_vm5, %v1046_v35 }
 0x41b   : > { %v1018_v37 = vpop.f32.mrf.mxu1 }
 0x41c   : > { %v1021_v12 = vpack.c.bf16 %v1018_v37, %v1018_v37 }
 0x41f   : > { %v839_v36 = vpop.f32.mrf.mxu3 }
 0x420   : > { %v842_v0 = vpack.c.bf16 %v839_v36, %v839_v36 }
 0x427   : > { %v868_v38 = vpop.f32.mrf.mxu3 }
 0x428   : > { %v871_v39 = vsel %vm2804_vm7, %v868_v38, -3.4028235e+38  ;;  %v1070_v40 = vpop.f32.mrf.mxu1 }
 0x429   : > { %v1073_v41 = vsel %vm2804_vm7, %v1070_v40, -3.4028235e+38  ;;  %v872_v42 = vsel %vm807_vm8, %v871_v39, -inf }
 0x42a   : > { %873 = vmax.xlane.f32.xlu0 %v872_v42  ;;  %v1074_v43 = vsel %vm807_vm8, %v1073_v41, -inf }
 0x42b   : > { %1075 = vmax.xlane.f32.xlu2 %v1074_v43 }
 0x43e   : > { %884 = vrot.lane.b32.xlu0 %v2790_v61, %s2595_s2 }
 0x443   : > { %1085 = vrot.lane.b32.xlu2 %v2790_v61, %s3181_s25  ;;  %s3198_s25 = smov 96  }
 0x49d   : > { %v874_v44 = vpop.xlane.xlu0 %873 }
 0x49e   : > { %v875_v45 = vsub.f32 %v871_v39, %v874_v44  ;;  %v1076_v46 = vpop.xlane.xlu2 %1075  ;;  %v2514_v44 = vld [vmem:[%s3166_s8] ss:$0 sm:$0xff] }
 0x49f   : > { %v1077_v47 = vsub.f32 %v1073_v41, %v1076_v46  ;;  %v2515_v46 = vld [vmem:[%s3167_s9] ss:$0 sm:$0xff] }
 0x4a0   : > { %v876_v48 = vmul.f32 1.442695, %v875_v45 }
 0x4a1   : > { %v1078_v49 = vmul.f32 1.442695, %v1077_v47 }
 0x4a2   : > { %2539 = vpow2.f32 %v876_v48 }
 0x4a3   : > { %2541 = vpow2.f32 %v1078_v49 }
 0x4a6   : > { %v1086_v50 = vpop.permute.xlu2 %1085 }
 0x4a7   : > { %1106 = vmatpush.msra.mxu0 %v1086_v50 }
 0x4a8   : > { %v2540_v51 = vpop.eup %2539 }
 0x4a9   : > { %v2542_v52 = vpop.eup %2541  ;;  %v878_v54 = vsel %vm807_vm8, %v2540_v51, 0.0 }
 0x4aa   : > { %879 = vadd.xlane.f32.xlu1 %v878_v54  ;;  %v1080_v55 = vsel %vm807_vm8, %v2542_v52, 0.0  ;;  %v2465_v54 = vld [vmem:[%s3170_s12 + $0x20] sm:$0xff] }
 0x4ab   : > { %1081 = vadd.xlane.f32.xlu0 %v1080_v55  ;;  %v2464_v55 = vld [vmem:[%s3170_s12 + $0x18] sm:$0xff] }
 0x4b0   : > { %v885_v56 = vpop.permute.xlu0 %884 }
 0x4b1   : > { %905 = vmatpush.msrb.mxu2 %v885_v56  ;;  %v2463_v56 = vld [vmem:[%s3170_s12 + $0x10] sm:$0xff] }
 0x4b3   : > { %949 = vmatpush.bf16.msra.mxu2 %v2453_v57  ;;  %v2462_v57 = vld [vmem:[%s3170_s12 + $0x8] sm:$0xff] }
 0x51d   : > { %v880_v58 = vpop.xlane.xlu1 %879 }
 0x51e   : > { %2543 = vrcp.f32 %v880_v58  ;;  %v1082_v59 = vpop.xlane.xlu0 %1081  ;;  %v2461_v58 = vld [vmem:[%s3170_s12] sm:$0xff] }
 0x51f   : > { %2545 = vrcp.f32 %v1082_v59  ;;  %v2516_v59 = vld [vmem:[%s3169_s11] ss:$0 sm:$0xff] }
 0x524   : > { %v2544_v60 = vpop.eup %2543 }
 0x525   : > { %v2546_v61 = vpop.eup %2545  ;;  %v882_v62 = vmul.f32 %v2544_v60, %v2540_v51  ;;  %v2467_v51 = vld [vmem:[%s3170_s12 + $0x30] sm:$0xff] }
 0x526   : > { %v1084_v63 = vmul.f32 %v2546_v61, %v2542_v52  ;;  %v2466_v52 = vld [vmem:[%s3170_s12 + $0x28] sm:$0xff] }
 0x527   : > { %2202 = vmatmul.msk.f32.vlgmr.msrb.gmra.mxu2 %vm807_vm8, %v882_v62 }
 0x528   : > { %2223 = vmatmul.msk.f32.vlgmr.msra.gmra.mxu0 %vm807_vm8, %v1084_v63  ;;  %1304 = vmatpush.bf16.msrb.mxu2 %v2468_v34  ;;  %v2472_v34 = vld [vmem:[%s3192_s4 + $0x54] sm:$0xf0] }
 0x52c   : > { %1305 = vmatpush.bf16.msrb.mxu2 %v2467_v51 }
 0x52f   : > { %2212 = vmatmul.msk.bf16.vlgmr.msra.gmra.mxu2 %vm777_vm5, %v842_v0 }
 0x530   : > { %1306 = vmatpush.bf16.msrb.mxu2 %v2466_v52 }
 0x534   : > { %1307 = vmatpush.bf16.msrb.mxu2 %v2465_v54 }
 0x538   : > { %1308 = vmatpush.bf16.msrb.mxu2 %v2464_v55  ;;  %v2518_v55 = vld [vmem:[%s3172_s14] ss:$0 sm:$0xff] }
 0x53c   : > { %1309 = vmatpush.bf16.msrb.mxu2 %v2463_v56 }
 0x540   : > { %1310 = vmatpush.bf16.msrb.mxu2 %v2462_v57  ;;  %v2519_v57 = vld [vmem:[%s3173_s15] ss:$0 sm:$0xff] }
 0x544   : > { %1311 = vmatpush.bf16.msrb.mxu2 %v2461_v58 }
 0x5a5   : > { %v1108_v4 = vpop.f32.mrf.mxu0 }
 0x5a6   : > { %v1111_v5 = vpack.c.bf16 %v1108_v4, %v1108_v4 }
 0x5a8   : > { %2228 = vmatmul.msk.bf16.vlgmr.msrb.gmra.mxu1 %vm777_vm5, %v1111_v5 }
 0x5aa   : > { %v907_v6 = vpop.f32.mrf.mxu2 }
 0x5ab   : > { %v910_v8 = vpack.c.bf16 %v907_v6, %v907_v6 }
 0x5ad   : > { %2207 = vmatmul.msk.bf16.vlgmr.msra.gmra.mxu3 %vm777_vm5, %v910_v8 }
 0x5ae   : > { %1217 = vmatpush.bf16.msra.mxu3 %v2460_v31 }
 0x5b2   : > { %v951_v10 = vpop.f32.mrf.mxu2 }
 0x5ba   : > { %v953_v11 = vpop.f32.mrf.mxu2 }
 0x5bb   : > { %v2517_v11 = vld [vmem:[%s3171_s13] ss:$0 sm:$0xff] }
 0x5bd   : > { %2220 = vmatmul.msk.bf16.vlgmr.msrb.gmra.mxu3 %vm777_vm5, %v1021_v12 }
 0x625   : > { %v1130_v13 = vpop.f32.mrf.mxu1 }
 0x62d   : > { %v1132_v14 = vpop.f32.mrf.mxu1 }
 0x630   : > { %v929_v15 = vpop.f32.mrf.mxu3 }
 0x631   : > { %v952_v17 = vadd.f32 %v951_v10, %v929_v15 }
 0x638   : > { %v931_v16 = vpop.f32.mrf.mxu3 }
 0x640   : > { %v1040_v18 = vpop.f32.mrf.mxu3 }
 0x641   : > { %v1044_v19 = vadd.f32 %v1040_v18, %v952_v17 }
 0x643   : > { %v1134_v21 = vadd.f32 %v1130_v13, %v1044_v19 }
 0x645   : > { %v1139_v22 = vadd.f32 %v2513_v20, %v1134_v21 }
 0x647   : > { %v1140_v23 = vadd.f32 %v1139_v22, %v2781_v53  ;;  %v2459_v53 = vld [vmem:[%s3168_s10 + $0x10] sm:$0xff] }
 0x648   : > { %v1042_v24 = vpop.f32.mrf.mxu3  ;;  %1218 = vmatpush.bf16.msra.mxu3 %v2459_v53  ;;  %v2313_v22 = vld [vmem:[%s3192_s4 + $0x70] sm:$0xf]  ;;  %v2307_v53 = vld [vmem:[%s3192_s4 + $0x68] sm:$0xf0] }
 0x649   : > { %v1143_v25 = vsel %vm644_vm0, %v1140_v23, 0.0  ;;  %v2475_v24 = vld [vmem:[%s3192_s4 + $0x74] sm:$0xf] }
 0x64a   : > { %1144 = vadd.xlane.f32.xlu1 %v1143_v25 }
 0x64c   : > { %1219 = vmatpush.bf16.msra.mxu3 %v2458_v32 }
 0x650   : > { %1220 = vmatpush.bf16.msra.mxu3 %v2457_v33  ;;  %v2297_v33 = vld [vmem:[%s3192_s4 + $0x50] sm:$0xf] }
 0x6bd   : > { %v1145_v26 = vpop.xlane.xlu1 %1144 }
 0x6be   : > { %v1146_v27 = vmul.f32 %v1145_v26, %v2722_v9  ;;  %v2315_v26 = vld [vmem:[%s3192_s4 + $0x78] sm:$0xf0] }
 0x6c0   : > { %v1147_v28 = vsub.f32 %v1140_v23, %v1146_v27  ;;  %v2476_v23 = vld [vmem:[%s3192_s4 + $0x74] sm:$0xf0]  ;;  %v2318_v27 = vor.u32 %v2475_v24, %v2315_v26 }
 0x6c1   : > { %v2314_v25 = vor.u32 %v2476_v23, %v2313_v22 }
 0x6c2   : > { %v1148_v29 = vmul.f32 %v1147_v28, %v1147_v28  ;;  %1427 = vmatpush.bf16.msra.mxu1 %v2318_v27 }
 0x6c3   : > { %1414 = vmatpush.bf16.msrb.mxu0 %v2314_v25 }
 0x6c4   : > { %v1149_v30 = vsel %vm644_vm0, %v1148_v29, 0.0  ;;  %v2474_v29 = vld [vmem:[%s3192_s4 + $0x64] sm:$0xf0] }
 0x6c5   : > { %1150 = vadd.xlane.f32.xlu1 %v1149_v30  ;;  %v2473_v30 = vld [vmem:[%s3192_s4 + $0x64] sm:$0xf] }
 0x6c6   : > { %v2310_v32 = vor.u32 %v2473_v30, %v2307_v53 }
 0x6c8   : > { %1428 = vmatpush.bf16.msra.mxu1 %v2310_v32 }
 0x738   : > { %v1151_v35 = vpop.xlane.xlu1 %1150 }
 0x739   : > { %v1152_v36 = vmul.f32 %v1151_v35, %v2722_v9  ;;  %v2471_v35 = vld [vmem:[%s3192_s4 + $0x54] sm:$0xf] }
 0x73b   : > { %v1153_v37 = vadd.f32 1e-12, %v1152_v36  ;;  %v2298_v36 = vor.u32 %v2472_v34, %v2297_v33 }
 0x73d   : > { %2547 = vrsqrt.f32 %v1153_v37  ;;  %vm1160_vm10 = vweird.f32 %v1153_v37 }
 0x743   : > { %v2548_v38 = vpop.eup %2547 }
 0x744   : > { %v1155_v39 = vmul.f32 %v2548_v38, %v1153_v37  ;;  %vm1161_vm9 = vweird.f32 %v2548_v38  ;;  %v2299_v37 = vld [vmem:[%s3192_s4 + $0x58] sm:$0xf0] }
 0x745   : > { %vm1162_vm11 = vmor %vm1160_vm10, %vm1161_vm9  ;;  %vm2099_vm9 = vcmask 0  }
 0x746   : > { %v1156_v40 = vmul.f32 %v2548_v38, %v1155_v39  ;;  %v2289_v39 = vld [vmem:[%s3192_s4 + $0x40] sm:$0xf] }
 0x748   : > { %v1157_v41 = vmul.f32 0.5, %v1156_v40  ;;  %v2470_v40 = vld [vmem:[%s3192_s4 + $0x44] sm:$0xf0] }
 0x74a   : > { %v1158_v42 = vsub.f32 1.5, %v1157_v41  ;;  %v2469_v41 = vld [vmem:[%s3192_s4 + $0x44] sm:$0xf] }
 0x74c   : > { %v1159_v43 = vmul.f32 %v2548_v38, %v1158_v42  ;;  %v2290_v42 = vor.u32 %v2470_v40, %v2289_v39  ;;  %v2478_v39 = vld [vmem:[%s3164_s6 + $0x28] sm:$0xff] }
 0x74e   : > { %v1163_v45 = vsel %vm1162_vm11, %v2548_v38, %v1159_v43  ;;  %v2302_v38 = vor.u32 %v2471_v35, %v2299_v37  ;;  %v2291_v43 = vld [vmem:[%s3192_s4 + $0x48] sm:$0xf0] }
 0x74f   : > { %v1164_v47 = vmul.f32 %v1163_v45, %v1147_v28  ;;  %v2305_v28 = vld [vmem:[%s3192_s4 + $0x60] sm:$0xf] }
 0x750   : > { %v2306_v31 = vor.u32 %v2474_v29, %v2305_v28  ;;  %1429 = vmatpush.bf16.msra.mxu1 %v2302_v38 }
 0x751   : > { %v1168_v48 = vmul.f32 %v2514_v44, %v1164_v47  ;;  %v2294_v44 = vor.u32 %v2469_v41, %v2291_v43 }
 0x752   : > { %1415 = vmatpush.bf16.msrb.mxu0 %v2306_v31 }
 0x753   : > { %v1172_v49 = vadd.f32 %v2515_v46, %v1168_v48 }
 0x754   : > { %1430 = vmatpush.bf16.msra.mxu1 %v2294_v44 }
 0x755   : > { %v1173_v50 = vpack.c.bf16 %v1172_v49, %v1172_v49 }
 0x756   : > { %1416 = vmatpush.bf16.msrb.mxu0 %v2298_v36 }
 0x757   : > { %2245 = vmatmul.msk.bf16.vlgmr.msra.gmra.mxu3 %vm644_vm0, %v1173_v50 }
 0x75a   : > { %1417 = vmatpush.bf16.msrb.mxu0 %v2290_v42 }
 0x7da   : > { %v1222_v60 = vpop.f32.mrf.mxu3 }
 0x7db   : > { %v1223_v61 = vadd.f32 %v2516_v59, %v1222_v60 }
 0x7dd   : > { %v1226_v62 = vmul.f32 %v1223_v61, %v1223_v61 }
 0x7df   : > { %v1227_v63 = vmul.f32 %v1226_v62, %v1223_v61  ;;  %v2286_v62 = vld [vmem:[%s3163_s5 + $0x2] sm:$0x3] }
 0x7e1   : > { %v1228_v0 = vmul.f32 0.044715, %v1227_v63  ;;  %v1363_v63 = vperm.slane %v2286_v62, 0 }
 0x7e2   : > { %v1224_v1 = vpop.f32.mrf.mxu3 }
 0x7e3   : > { %v1229_v2 = vadd.f32 %v1228_v0, %v1223_v61  ;;  %v1364_v0 = vperm.slane %v2286_v62, 1 }
 0x7e5   : > { %v1230_v3 = vmul.f32 0.7978846, %v1229_v2 }
 0x7e7   : > { %2549 = vtanh.f32 %v1230_v3 }
 0x7ed   : > { %v2550_v4 = vpop.eup %2549 }
 0x7ee   : > { %v1232_v5 = vadd.f32 1.0, %v2550_v4 }
 0x7f0   : > { %v1233_v6 = vmul.f32 0.5, %v1232_v5 }
 0x7f2   : > { %v1234_v8 = vmul.f32 %v1233_v6, %v1223_v61 }
 0x7f4   : > { %v1235_v10 = vpack.c.bf16 %v1234_v8, %v1234_v8 }
 0x7f6   : > { %1312 = vmatmul.bf16.vlgmr.msrb.gmra.mxu2 %v1235_v10 }
 0x879   : > { %v1313_v12 = vpop.f32.mrf.mxu2 }
 0x87a   : > { %v1314_v13 = vadd.f32 %v2517_v11, %v1313_v12 }
 0x87c   : > { %v1317_v14 = vadd.f32 %v1314_v13, %v1172_v49 }
 0x87e   : > { %v1320_v15 = vsel %vm644_vm0, %v1317_v14, 0.0 }
 0x87f   : > { %1321 = vadd.xlane.f32.xlu1 %v1320_v15 }
 0x881   : > { %v1315_v16 = vpop.f32.mrf.mxu2 }
 0x8f2   : > { %v1322_v17 = vpop.xlane.xlu1 %1321 }
 0x8f3   : > { %v1323_v18 = vmul.f32 %v1322_v17, %v2722_v9 }
 0x8f5   : > { %v1324_v19 = vsub.f32 %v1317_v14, %v1323_v18 }
 0x8f7   : > { %v1325_v20 = vmul.f32 %v1324_v19, %v1324_v19 }
 0x8f9   : > { %v1326_v21 = vsel %vm644_vm0, %v1325_v20, 0.0 }
 0x8fa   : > { %1327 = vadd.xlane.f32.xlu2 %v1326_v21 }
 0x96d   : > { %v1328_v45 = vpop.xlane.xlu2 %1327 }
 0x96e   : > { %v1329_v46 = vmul.f32 %v1328_v45, %v2722_v9 }
 0x970   : > { %v1330_v47 = vadd.f32 1e-12, %v1329_v46 }
 0x972   : > { %2551 = vrsqrt.f32 %v1330_v47  ;;  %vm1337_vm13 = vweird.f32 %v1330_v47 }
 0x978   : > { %v2552_v48 = vpop.eup %2551 }
 0x979   : > { %v1332_v49 = vmul.f32 %v2552_v48, %v1330_v47  ;;  %vm1338_vm12 = vweird.f32 %v2552_v48 }
 0x97a   : > { %vm1339_vm14 = vmor %vm1337_vm13, %vm1338_vm12 }
 0x97b   : > { %v1333_v50 = vmul.f32 %v2552_v48, %v1332_v49  ;;  %v2477_v49 = vld [vmem:[%s3164_s6 + $0x20] sm:$0xff] }
 0x97d   : > { %v1334_v51 = vmul.f32 0.5, %v1333_v50 }
 0x97f   : > { %v1335_v52 = vsub.f32 1.5, %v1334_v51 }
 0x981   : > { %v1336_v54 = vmul.f32 %v2552_v48, %v1335_v52 }
 0x983   : > { %v1340_v56 = vsel %vm1339_vm14, %v2552_v48, %v1336_v54 }
 0x984   : > { %v1341_v58 = vmul.f32 %v1340_v56, %v1324_v19 }
 0x986   : > { %v1345_v59 = vmul.f32 %v2518_v55, %v1341_v58 }
 0x988   : > { %v2973_v60 = vadd.f32 %v2519_v57, %v1345_v59  ;;  %v2479_v59 = vld [vmem:[%s3164_s6 + $0x30] sm:$0xff] }
 0x98a   : > { %v1350_v61 = vpack.c.bf16 %v2973_v60, %v2973_v60 }
 0x98c   : > { %2319 = vmatmul.msk.bf16.vlgmr.msrb.gmra.mxu0 %vm644_vm0, %v1350_v61  ;;  %2320 = vmatmul.msk.bf16.vlgmr.msra.gmra.mxu1 %vm644_vm0, %v1350_v61 }
 0xa09   : > { %v1419_v1 = vpop.f32.mrf.mxu0  ;;  %v1432_v2 = vpop.f32.mrf.mxu1 }
 0xa0a   : > { %v2982_v3 = vadd.f32 %v1419_v1, %v1363_v63  ;;  %v2984_v4 = vadd.f32 %v1432_v2, %v1364_v0 }
 0xa0c   : > { %1502 = vmatpush.msra.mxu0 %v2984_v4  ;;  %1508 = vrot.lane.b32.xlu0 %v2982_v3, %s2595_s2 }
 0xa0d   : > { %1510 = vrot.lane.b32.xlu1 %v2982_v3, %s2594_s19  ;;  %s3200_s19 = smov 80  }
 0xa0e   : > { %1592 = vmatpush.bf16.msrb.mxu0 %v2478_v39 }
 0xa11   : > { %v1421_v5 = vpop.f32.mrf.mxu0  ;;  %v1434_v6 = vpop.f32.mrf.mxu1 }
 0xa14   : > { %1446 = vrot.lane.b32.xlu0 %v2982_v3, %s2591_s29  ;;  %s3199_s29 = smov 32  }
 0xa1c   : > { %1549 = vrot.lane.b32.xlu0 %v2984_v4, %s2595_s2 }
 0xa24   : > { %1620 = vrot.lane.b32.xlu0 %v2982_v3, %s3198_s25 }
 0xa7e   : > { %v1509_v8 = vpop.permute.xlu0 %1508 }
 0xa7f   : > { %v1511_v10 = vpop.permute.xlu1 %1510 }
 0xa80   : > { %2332 = vmatpush.xpose.msk.msrb.mxu1 %vm777_vm5, %v1511_v10 }
 0xa83   : > { %2333 = vmatmul.msk.f32.vlgmr.msrb.gmra.mxu1 %vm777_vm5, %v1509_v8 }
 0xa84   : > { %1614 = vmatpush.bf16.msra.mxu1 %v2477_v49 }
 0xa86   : > { %v1447_v11 = vpop.permute.xlu0 %1446 }
 0xa87   : > { %2329 = vmatpush.xpose.msk.msrb.mxu3 %vm777_vm5, %v1447_v11 }
 0xa8a   : > { %2330 = vmatmul.msk.f32.vlgmr.msrb.gmra.mxu3 %vm777_vm5, %v2982_v3 }
 0xa8e   : > { %v1550_v12 = vpop.permute.xlu0 %1549 }
 0xa8f   : > { %1570 = vmatpush.msra.mxu3 %v1550_v12 }
 0xa96   : > { %v1621_v29 = vpop.permute.xlu0 %1620 }
 0xb00   : > { %v1533_v13 = vpop.f32.mrf.mxu1 }
 0xb01   : > { %v1536_v14 = vsel %vm2804_vm7, %v1533_v13, -3.4028235e+38 }
 0xb02   : > { %v1537_v15 = vsel %vm807_vm8, %v1536_v14, -inf }
 0xb03   : > { %1538 = vmax.xlane.f32.xlu1 %v1537_v15 }
 0xb0d   : > { %v1469_v21 = vpop.f32.mrf.mxu3 }
 0xb0e   : > { %v1472_v22 = vsel %vm2804_vm7, %v1469_v21, -3.4028235e+38 }
 0xb0f   : > { %v1473_v23 = vsel %vm807_vm8, %v1472_v22, -inf }
 0xb76   : > { %v1539_v16 = vpop.xlane.xlu1 %1538 }
 0xb77   : > { %v1540_v17 = vsub.f32 %v1536_v14, %v1539_v16 }
 0xb79   : > { %v1541_v18 = vmul.f32 1.442695, %v1540_v17 }
 0xb7b   : > { %2553 = vpow2.f32 %v1541_v18 }
 0xb81   : > { %v2554_v19 = vpop.eup %2553 }
 0xb82   : > { %v1543_v20 = vsel %vm807_vm8, %v2554_v19, 0.0 }
 0xb83   : > { %1544 = vadd.xlane.f32.xlu2 %v1543_v20 }
 0xb9b   : > { %1622 = vrot.lane.b32.xlu2 %v2982_v3, %s3199_s29 }
 0xba3   : > { %1660 = vrot.lane.b32.xlu2 %v2984_v4, %s3198_s25 }
 0xbab   : > { %1710 = vrot.lane.b32.xlu2 %v2982_v3, %s3200_s19 }
 0xbd4   : > { %1474 = vmax.xlane.f32.xlu2 %v1473_v23 }
 0xbf6   : > { %v1545_v24 = vpop.xlane.xlu2 %1544 }
 0xbf7   : > { %2555 = vrcp.f32 %v1545_v24 }
 0xbfd   : > { %v2556_v25 = vpop.eup %2555 }
 0xbfe   : > { %v1547_v26 = vmul.f32 %v2556_v25, %v2554_v19  ;;  %v1623_v27 = vpop.permute.xlu2 %1622  ;;  %v2480_v19 = vld [vmem:[%s3164_s6 + $0x38] sm:$0xff] }
 0xbff   : > { %2345 = vmatpush.xpose.msk.msrb.mxu3 %vm777_vm5, %v1623_v27  ;;  %1793 = vmatpush.bf16.msrb.mxu1 %v2480_v19 }
 0xc00   : > { %2334 = vmatmul.msk.f32.vlgmr.msra.gmra.mxu3 %vm807_vm8, %v1547_v26 }
 0xc03   : > { %1703 = vmatpush.bf16.msra.mxu3 %v2479_v59  ;;  %v2485_v59 = vld [vmem:[%s3170_s12 + $0x40] sm:$0xff] }
 0xc06   : > { %v1661_v28 = vpop.permute.xlu2 %1660 }
 0xc07   : > { %1681 = vmatpush.msra.mxu2 %v1661_v28 }
 0xc08   : > { %2346 = vmatmul.msk.f32.vlgmr.msrb.gmra.mxu3 %vm777_vm5, %v1621_v29 }
 0xc0e   : > { %v1711_v30 = vpop.permute.xlu2 %1710 }
 0xc47   : > { %v1475_v31 = vpop.xlane.xlu2 %1474 }
 0xc48   : > { %v1476_v32 = vsub.f32 %v1472_v22, %v1475_v31 }
 0xc4a   : > { %v1477_v33 = vmul.f32 1.442695, %v1476_v32  ;;  %v2484_v32 = vld [vmem:[%s3168_s10 + $0x38] sm:$0xff] }
 0xc4b   : > { %1887 = vmatpush.bf16.msrb.mxu3 %v2484_v32 }
 0xc4c   : > { %2557 = vpow2.f32 %v1477_v33  ;;  %v2482_v33 = vld [vmem:[%s3168_s10 + $0x28] sm:$0xff] }
 0xc52   : > { %v2558_v37 = vpop.eup %2557 }
 0xc53   : > { %v1479_v38 = vsel %vm807_vm8, %v2558_v37, 0.0 }
 0xc83   : > { %v1572_v53 = vpop.f32.mrf.mxu3 }
 0xc84   : > { %v1575_v48 = vpack.c.bf16 %v1572_v53, %v1572_v53 }
 0xc8b   : > { %v1645_v34 = vpop.f32.mrf.mxu3 }
 0xc8c   : > { %v1648_v35 = vsel %vm2804_vm7, %v1645_v34, -3.4028235e+38  ;;  %v2481_v34 = vld [vmem:[%s3168_s10 + $0x20] sm:$0xff] }
 0xc8d   : > { %v1649_v36 = vsel %vm807_vm8, %v1648_v35, -inf }
 0xc8e   : > { %1650 = vmax.xlane.f32.xlu0 %v1649_v36 }
 0xc96   : > { %1480 = vadd.xlane.f32.xlu0 %v1479_v38 }
 0xd01   : > { %v1651_v40 = vpop.xlane.xlu0 %1650 }
 0xd02   : > { %v1652_v41 = vsub.f32 %v1648_v35, %v1651_v40  ;;  %v2492_v35 = vld [vmem:[%s3170_s12 + $0x78] sm:$0xff] }
 0xd04   : > { %v1653_v42 = vmul.f32 1.442695, %v1652_v41 }
 0xd06   : > { %2559 = vpow2.f32 %v1653_v42 }
 0xd09   : > { %v1481_v43 = vpop.xlane.xlu0 %1480 }
 0xd0a   : > { %2561 = vrcp.f32 %v1481_v43 }
 0xd0c   : > { %v2560_v44 = vpop.eup %2559 }
 0xd0d   : > { %v1655_v45 = vsel %vm807_vm8, %v2560_v44, 0.0 }
 0xd0e   : > { %1656 = vadd.xlane.f32.xlu1 %v1655_v45  ;;  %v2521_v45 = vld [vmem:[%s3166_s8 + $0x1] ss:$0 sm:$0xff] }
 0xd10   : > { %v2562_v46 = vpop.eup %2561 }
 0xd11   : > { %v1483_v47 = vmul.f32 %v2562_v46, %v2558_v37 }
 0xd13   : > { %2331 = vmatmul.msk.f32.vlgmr.msra.gmra.mxu0 %vm807_vm8, %v1483_v47  ;;  %v2522_v47 = vld [vmem:[%s3167_s9 + $0x1] ss:$0 sm:$0xff] }
 0xd1b   : > { %2339 = vmatmul.msk.bf16.vlgmr.msrb.gmra.mxu0 %vm777_vm5, %v1575_v48 }
 0xd27   : > { %1712 = vrot.lane.b32.xlu1 %v2982_v3, %s3201_s28 }
 0xd81   : > { %v1657_v50 = vpop.xlane.xlu1 %1656 }
 0xd82   : > { %2563 = vrcp.f32 %v1657_v50 }
 0xd88   : > { %v2564_v51 = vpop.eup %2563 }
 0xd89   : > { %v1659_v52 = vmul.f32 %v2564_v51, %v2560_v44 }
 0xd8b   : > { %2347 = vmatmul.msk.f32.vlgmr.msra.gmra.mxu2 %vm807_vm8, %v1659_v52  ;;  %v2491_v52 = vld [vmem:[%s3170_s12 + $0x70] sm:$0xff] }
 0xd90   : > { %v1504_v54 = vpop.f32.mrf.mxu0 }
 0xd91   : > { %v1507_v55 = vpack.c.bf16 %v1504_v54, %v1504_v54  ;;  %v2490_v54 = vld [vmem:[%s3170_s12 + $0x68] sm:$0xff] }
 0xd93   : > { %2344 = vmatmul.msk.bf16.vlgmr.msra.gmra.mxu1 %vm777_vm5, %v1507_v55  ;;  %v2489_v55 = vld [vmem:[%s3170_s12 + $0x60] sm:$0xff] }
 0xd98   : > { %v1594_v56 = vpop.f32.mrf.mxu0 }
 0xd99   : > { %v1713_v57 = vpop.permute.xlu1 %1712 }
 0xd9a   : > { %2353 = vmatpush.xpose.msk.msrb.mxu2 %vm777_vm5, %v1713_v57  ;;  %v2487_v57 = vld [vmem:[%s3170_s12 + $0x50] sm:$0xff] }
 0xd9d   : > { %2354 = vmatmul.msk.f32.vlgmr.msrb.gmra.mxu2 %vm777_vm5, %v1711_v30 }
 0xd9e   : > { %1976 = vmatpush.bf16.msra.mxu2 %v2492_v35 }
 0xda0   : > { %v1596_v58 = vpop.f32.mrf.mxu0 }
 0xda1   : > { %v2486_v58 = vld [vmem:[%s3170_s12 + $0x48] sm:$0xff] }
 0xda2   : > { %1977 = vmatpush.bf16.msra.mxu2 %v2491_v52 }
 0xda6   : > { %1978 = vmatpush.bf16.msra.mxu2 %v2490_v54 }
 0xdaa   : > { %1979 = vmatpush.bf16.msra.mxu2 %v2489_v55 }
 0xe0e   : > { %v1683_v61 = vpop.f32.mrf.mxu2 }
 0xe0f   : > { %v1686_v62 = vpack.c.bf16 %v1683_v61, %v1683_v61  ;;  %v2523_v61 = vld [vmem:[%s3169_s11 + $0x1] ss:$0 sm:$0xff] }
 0xe10   : > { %v1616_v63 = vpop.f32.mrf.mxu1 }
 0xe11   : > { %2352 = vmatmul.msk.bf16.vlgmr.msra.gmra.mxu3 %vm777_vm5, %v1686_v62  ;;  %v1617_v5 = vadd.f32 %v1616_v63, %v1594_v56  ;;  %v2488_v56 = vld [vmem:[%s3170_s12 + $0x58] sm:$0xff] }
 0xe12   : > { %1980 = vmatpush.bf16.msra.mxu2 %v2488_v56 }
 0xe16   : > { %1981 = vmatpush.bf16.msra.mxu2 %v2487_v57 }
 0xe18   : > { %v1618_v0 = vpop.f32.mrf.mxu1 }
 0xe1a   : > { %1982 = vmatpush.bf16.msra.mxu2 %v2486_v58 }
 0xe1e   : > { %1983 = vmatpush.bf16.msra.mxu2 %v2485_v59  ;;  %v2047_v59 = vld [vmem:[%s3175_s17] sm:$0x1] }
 0xe20   : > { %v1735_v1 = vpop.f32.mrf.mxu2 }
 0xe21   : > { %v1738_v2 = vsel %vm2804_vm7, %v1735_v1, -3.4028235e+38  ;;  %vm2074_vm7 = vcmask 253952  }
 0xe22   : > { %v1739_v3 = vsel %vm807_vm8, %v1738_v2, -inf }
 0xe23   : > { %1740 = vmax.xlane.f32.xlu1 %v1739_v3 }
 0xe94   : > { %v1705_v6 = vpop.f32.mrf.mxu3 }
 0xe95   : > { %v1709_v8 = vadd.f32 %v1705_v6, %v1617_v5 }
 0xe96   : > { %v1741_v10 = vpop.xlane.xlu1 %1740 }
 0xe97   : > { %v1742_v11 = vsub.f32 %v1738_v2, %v1741_v10 }
 0xe99   : > { %v1743_v12 = vmul.f32 1.442695, %v1742_v11 }
 0xe9b   : > { %2565 = vpow2.f32 %v1743_v12 }
 0xe9c   : > { %v1707_v13 = vpop.f32.mrf.mxu3 }
 0xea1   : > { %v2566_v14 = vpop.eup %2565 }
 0xea2   : > { %v1745_v15 = vsel %vm807_vm8, %v2566_v14, 0.0 }
 0xea3   : > { %1746 = vadd.xlane.f32.xlu0 %v1745_v15 }
 0xeb7   : > { %1750 = vrot.lane.b32.xlu0 %v2984_v4, %s3200_s19  ;;  %v2520_v4 = vld [vmem:[%s3165_s7 + $0x1] ss:$0 sm:$0xff] }
 0xf16   : > { %v1747_v7 = vpop.xlane.xlu0 %1746 }
 0xf17   : > { %2567 = vrcp.f32 %v1747_v7 }
 0xf1d   : > { %v2568_v16 = vpop.eup %2567 }
 0xf1e   : > { %v1749_v17 = vmul.f32 %v2568_v16, %v2566_v14  ;;  %v2524_v14 = vld [vmem:[%s3171_s13 + $0x1] ss:$0 sm:$0xff] }
 0xf29   : > { %v1751_v18 = vpop.permute.xlu0 %1750 }
 0xf2a   : > { %1771 = vmatpush.msra.mxu0 %v1751_v18 }
 0xf2b   : > { %2355 = vmatmul.msk.f32.vlgmr.msra.gmra.mxu0 %vm807_vm8, %v1749_v17 }
 0xfa8   : > { %v1773_v20 = vpop.f32.mrf.mxu0 }
 0xfa9   : > { %v1776_v21 = vpack.c.bf16 %v1773_v20, %v1773_v20 }
 0xfab   : > { %2360 = vmatmul.msk.bf16.vlgmr.msrb.gmra.mxu1 %vm777_vm5, %v1776_v21 }
0x1028   : > { %v1795_v22 = vpop.f32.mrf.mxu1 }
0x1029   : > { %v1799_v23 = vadd.f32 %v1795_v22, %v1709_v8 }
0x102b   : > { %v1805_v24 = vadd.f32 %v2520_v4, %v1799_v23  ;;  %v2046_v23 = vld [vmem:[%s3174_s16 + $0x38] sm:$0xff] }
0x102c   : > { %2059 = vmatpush.msrb.mxu0 %v2046_v23 }
0x102d   : > { %v1806_v25 = vadd.f32 %v1805_v24, %v2973_v60  ;;  %v2483_v60 = vld [vmem:[%s3168_s10 + $0x30] sm:$0xff] }
0x102e   : > { %1888 = vmatpush.bf16.msrb.mxu3 %v2483_v60  ;;  %v2045_v24 = vld [vmem:[%s3174_s16 + $0x30] sm:$0xff] }
0x102f   : > { %v1811_v26 = vsel %vm644_vm0, %v1806_v25, 0.0  ;;  %2060 = vmatpush.msrb.mxu0 %v2045_v24 }
0x1030   : > { %1812 = vadd.xlane.f32.xlu2 %v1811_v26  ;;  %v1797_v27 = vpop.f32.mrf.mxu1  ;;  %v2044_v26 = vld [vmem:[%s3174_s16 + $0x28] sm:$0xff] }
0x1031   : > { %v2043_v27 = vld [vmem:[%s3174_s16 + $0x20] sm:$0xff]  ;;  %2061 = vmatpush.msrb.mxu0 %v2044_v26 }
0x1032   : > { %1889 = vmatpush.bf16.msrb.mxu3 %v2482_v33 }
0x1033   : > { %2062 = vmatpush.msrb.mxu0 %v2043_v27 }
0x1036   : > { %1890 = vmatpush.bf16.msrb.mxu3 %v2481_v34  ;;  %v2598_v34 = vmov 8.0  }
0x10a3   : > { %v1813_v28 = vpop.xlane.xlu2 %1812 }
0x10a4   : > { %v1814_v29 = vmul.f32 %v1813_v28, %v2722_v9 }
0x10a6   : > { %v1815_v30 = vsub.f32 %v1806_v25, %v1814_v29  ;;  %v2042_v29 = vld [vmem:[%s3174_s16 + $0x18] sm:$0xff] }
0x10a7   : > { %2063 = vmatpush.msrb.mxu0 %v2042_v29 }
0x10a8   : > { %v1816_v31 = vmul.f32 %v1815_v30, %v1815_v30 }
0x10aa   : > { %v1817_v53 = vsel %vm644_vm0, %v1816_v31, 0.0  ;;  %v2041_v31 = vld [vmem:[%s3174_s16 + $0x10] sm:$0xff] }
0x10ab   : > { %1818 = vadd.xlane.f32.xlu2 %v1817_v53  ;;  %v2040_v53 = vld [vmem:[%s3174_s16 + $0x8] sm:$0xff]  ;;  %2064 = vmatpush.msrb.mxu0 %v2041_v31 }
0x10ad   : > { %2065 = vmatpush.msrb.mxu0 %v2040_v53 }
0x111e   : > { %v1819_v36 = vpop.xlane.xlu2 %1818 }
0x111f   : > { %v1820_v37 = vmul.f32 %v1819_v36, %v2722_v9 }
0x1121   : > { %v1821_v38 = vadd.f32 1e-12, %v1820_v37 }
0x1123   : > { %2569 = vrsqrt.f32 %v1821_v38  ;;  %vm1828_vm1 = vweird.f32 %v1821_v38 }
0x1129   : > { %v2570_v39 = vpop.eup %2569 }
0x112a   : > { %v1823_v40 = vmul.f32 %v2570_v39, %v1821_v38  ;;  %vm1829_vm15 = vweird.f32 %v2570_v39 }
0x112b   : > { %vm1830_vm2 = vmor %vm1828_vm1, %vm1829_vm15 }
0x112c   : > { %v1824_v41 = vmul.f32 %v2570_v39, %v1823_v40 }
0x112e   : > { %v1825_v42 = vmul.f32 0.5, %v1824_v41  ;;  %v2526_v41 = vld [vmem:[%s3173_s15 + $0x1] ss:$0 sm:$0xff] }
0x1130   : > { %v1826_v43 = vsub.f32 1.5, %v1825_v42 }
0x1132   : > { %v1827_v44 = vmul.f32 %v2570_v39, %v1826_v43 }
0x1134   : > { %v1831_v46 = vsel %vm1830_vm2, %v2570_v39, %v1827_v44  ;;  %v2525_v39 = vld [vmem:[%s3172_s14 + $0x1] ss:$0 sm:$0xff] }
0x1135   : > { %v1832_v48 = vmul.f32 %v1831_v46, %v1815_v30 }
0x1137   : > { %v1836_v49 = vmul.f32 %v2521_v45, %v1832_v48 }
0x1139   : > { %v1840_v50 = vadd.f32 %v2522_v47, %v1836_v49 }
0x113b   : > { %v1841_v51 = vpack.c.bf16 %v1840_v50, %v1840_v50 }
0x113d   : > { %2389 = vmatmul.msk.bf16.vlgmr.msrb.gmra.mxu3 %vm644_vm0, %v1841_v51 }
0x11c0   : > { %v1892_v62 = vpop.f32.mrf.mxu3 }
0x11c1   : > { %v1893_v63 = vadd.f32 %v2523_v61, %v1892_v62 }
0x11c3   : > { %v1896_v0 = vmul.f32 %v1893_v63, %v1893_v63 }
0x11c5   : > { %v1897_v1 = vmul.f32 %v1896_v0, %v1893_v63 }
0x11c7   : > { %v1898_v2 = vmul.f32 0.044715, %v1897_v1 }
0x11c8   : > { %v1894_v3 = vpop.f32.mrf.mxu3 }
0x11c9   : > { %v1899_v5 = vadd.f32 %v1898_v2, %v1893_v63  ;;  %v2078_v3 = vld [vmem:[#allocation2] sm:$0x1] }
0x11cb   : > { %v1900_v6 = vmul.f32 0.7978846, %v1899_v5 }
0x11cd   : > { %2571 = vtanh.f32 %v1900_v6 }
0x11d3   : > { %v2572_v8 = vpop.eup %2571 }
0x11d4   : > { %v1902_v10 = vadd.f32 1.0, %v2572_v8 }
0x11d6   : > { %v1903_v11 = vmul.f32 0.5, %v1902_v10 }
0x11d8   : > { %v1904_v12 = vmul.f32 %v1903_v11, %v1893_v63  ;;  %v2072_v63 = vld [vmem:[%s3176_s18] sm:$0x1] }
0x11da   : > { %v1905_v13 = vpack.c.bf16 %v1904_v12, %v1904_v12 }
0x11dc   : > { %1984 = vmatmul.bf16.vlgmr.msra.gmra.mxu2 %v1905_v13 }
0x125f   : > { %v1985_v15 = vpop.f32.mrf.mxu2 }
0x1260   : > { %v1986_v7 = vadd.f32 %v2524_v14, %v1985_v15 }
0x1262   : > { %v1989_v16 = vadd.f32 %v1986_v7, %v1840_v50 }
0x1264   : > { %v1994_v17 = vsel %vm644_vm0, %v1989_v16, 0.0 }
0x1265   : > { %1995 = vadd.xlane.f32.xlu0 %v1994_v17 }
0x1267   : > { %v1987_v18 = vpop.f32.mrf.mxu2 }
0x12d8   : > { %v1996_v19 = vpop.xlane.xlu0 %1995 }
0x12d9   : > { %v1997_v20 = vmul.f32 %v1996_v19, %v2722_v9 }
0x12db   : > { %v1998_v21 = vsub.f32 %v1989_v16, %v1997_v20 }
0x12dd   : > { %v1999_v4 = vmul.f32 %v1998_v21, %v1998_v21 }
0x12df   : > { %v2000_v22 = vsel %vm644_vm0, %v1999_v4, 0.0 }
0x12e0   : > { %2001 = vadd.xlane.f32.xlu1 %v2000_v22 }
0x1353   : > { %v2002_v25 = vpop.xlane.xlu1 %2001 }
0x1354   : > { %v2003_v28 = vmul.f32 %v2002_v25, %v2722_v9  ;;  %v2039_v9 = vld [vmem:[%s3174_s16] sm:$0xff] }
0x1355   : > { %2066 = vmatpush.msrb.mxu0 %v2039_v9 }
0x1356   : > { %v2004_v30 = vadd.f32 1e-12, %v2003_v28 }
0x1358   : > { %2573 = vrsqrt.f32 %v2004_v30  ;;  %vm2011_vm4 = vweird.f32 %v2004_v30 }
0x1359   : > { %2575 = vrcp.f32 %v2598_v34 }
0x135e   : > { %v2574_v32 = vpop.eup %2573 }
0x135f   : > { %v2006_v60 = vmul.f32 %v2574_v32, %v2004_v30  ;;  %vm2012_vm3 = vweird.f32 %v2574_v32  ;;  %v2576_v37 = vpop.eup %2575 }
0x1360   : > { %vm2013_vm5 = vmor %vm2011_vm4, %vm2012_vm3  ;;  %v2032_v43 = vmul.f32 8.0, %v2576_v37  ;;  %vm2036_vm6 = vweird.f32 %v2576_v37 }
0x1361   : > { %v2007_v33 = vmul.f32 %v2574_v32, %v2006_v60 }
0x1362   : > { %v2033_v46 = vsub.f32 1.0, %v2032_v43 }
0x1363   : > { %v2008_v35 = vmul.f32 0.5, %v2007_v33 }
0x1364   : > { %v2034_v49 = vmul.f32 %v2576_v37, %v2033_v46 }
0x1365   : > { %v2009_v36 = vsub.f32 1.5, %v2008_v35 }
0x1366   : > { %v2035_v52 = vadd.f32 %v2576_v37, %v2034_v49 }
0x1367   : > { %v2010_v38 = vmul.f32 %v2574_v32, %v2009_v36 }
0x1368   : > { %v2037_v56 = vsel %vm2036_vm6, %v2576_v37, %v2035_v52 }
0x1369   : > { %v2014_v40 = vsel %vm2013_vm5, %v2574_v32, %v2010_v38 }
0x136a   : > { %v2015_v42 = vmul.f32 %v2014_v40, %v1998_v21 }
0x136c   : > { %v2019_v44 = vmul.f32 %v2525_v39, %v2015_v42 }
0x136e   : > { %v2023_v45 = vadd.f32 %v2526_v41, %v2019_v44 }
0x1370   : > { %v2024_v47 = vsel %vm644_vm0, %v2023_v45, 0.0 }
0x1371   : > { %v2025_v48 = vrot.slane %v2024_v47, 4 }
0x1373   : > { %v2026_v50 = vadd.f32 %v2025_v48, %v2024_v47 }
0x1375   : > { %v2027_v51 = vrot.slane %v2026_v50, 2 }
0x1377   : > { %v2028_v54 = vadd.f32 %v2027_v51, %v2026_v50 }
0x1379   : > { %v2029_v55 = vrot.slane %v2028_v54, 1 }
0x137b   : > { %v2030_v57 = vadd.f32 %v2029_v55, %v2028_v54 }
0x137d   : > { %v2038_v58 = vmul.f32 %v2037_v56, %v2030_v57 }
0x137f   : > { %2441 = vmatmul.msk.f32.vlgmr.msrb.gmra.mxu0 %vm644_vm0, %v2038_v58 }
0x13fc   : > { %v2068_v61 = vpop.f32.mrf.mxu0 }
0x13fd   : > { %v2069_v62 = vadd.f32 %v2068_v61, %v2047_v59 }
0x13ff   : > { %v2071_v0 = vmax.f32 %v2069_v62, 0.0 }
0x1401   : > { %v2073_v1 = vmul.f32 %v2072_v63, %v2071_v0 }
0x1403   : > { %v2075_v2 = vsel %vm2074_vm7, %v2073_v1, 0.0 }
0x1404   : > { %2076 = vadd.xlane.f32.xlu2 %v2075_v2 }
0x1477   : > { %v2077_v5 = vpop.xlane.xlu2 %2076 }
0x1478   : > { %v2079_v6 = vadd.f32 %v2078_v3, %v2077_v5 }
0x147a   : > { %v2442_v8 = vmul.f32 -1.442695, %v2079_v6 }
0x147c   : > { %2577 = vpow2.f32 %v2442_v8 }
0x1482   : > { %v2578_v10 = vpop.eup %2577 }
0x1483   : > { %v2083_v11 = vadd.f32 1.0, %v2578_v10 }
0x1485   : > { %2579 = vrcp.f32 %v2083_v11  ;;  %v2095_v15 = vand.u32 2147483648, %v2083_v11  ;;  %v2093_v16 = vand.u32 2147483647, %v2083_v11  ;;  %vm2089_vm8 = vweird.f32 %v2083_v11 }
0x1487   : > { %v2096_v18 = vor.u32 1.1754944e-38, %v2095_v15  ;;  %vm2094_vm11 = vcmp.eq.f32.partialorder %v2093_v16, 8.507059e+37 }
0x148b   : > { %v2580_v12 = vpop.eup %2579 }
0x148c   : > { %v2085_v13 = vmul.f32 %v2580_v12, %v2083_v11  ;;  %vm2090_vm0 = vweird.f32 %v2580_v12 }
0x148d   : > { %vm2091_vm10 = vmor %vm2089_vm8, %vm2090_vm0 }
0x148e   : > { %v2086_v14 = vsub.f32 1.0, %v2085_v13 }
0x1490   : > { %v2087_v7 = vmul.f32 %v2580_v12, %v2086_v14 }
0x1492   : > { %v2088_v17 = vadd.f32 %v2580_v12, %v2087_v7 }
0x1494   : > { %v2092_v19 = vsel %vm2091_vm10, %v2580_v12, %v2088_v17 }
0x1495   : > { %v2097_v20 = vsel %vm2094_vm11, %v2096_v18, %v2092_v19 }
0x1496   : > { %2100 = vst.msk [vmem:[%s638_s1] sm:$0x1] %vm2099_vm9, %v2097_v20 }
0x1497 PF: > { %s32_s23 = sadd.s32 1, %s2587_s23  }
0x1498   : > { %p29_p4 = scmp.ge.s32.totalorder %s32_s23, 4  }
0x149a   :  { %31 = sbr.rel (!%p29_p4) target bundleno = 6 (0x6), region = 145 }

</bundles_post_ra>
